<compile_context>
chip_gen: v7x
topology: tpu7x:2x2x1
jax: 0.10.0
libtpu: 0.0.40
codegen_flags: <defaults>
</compile_context>

<pallas_src>
import functools

import jax
import jax.numpy as jnp
from jax import lax
from jax.experimental import pallas as pl
from jax.experimental.pallas import tpu as pltpu

# Synthetic hyper-parameters standing in for SSIT's `netD_params`
# (scaled down so the example runs at small shapes).
NETD_PARAMS = dict(base_dim=8, netD_num=2, n_layers=3)

_VMEM_LIMIT = 32 * 1024 * 1024          # safe on v5e/v6e/v7x
_TILE_VMEM_BUDGET = 12 << 20            # keep tile working set well under limit


def _round_up(a, m):
    return (a + m - 1) // m * m


# ----------------------------- conv GEMM kernels -----------------------------

def _gemm_kernel_single(w_ref, x_ref, b_ref, o_ref, *, leaky):
    """Single-K-step GEMM: no scratch accumulator, straight to the output tile."""
    y = jnp.dot(w_ref[...], x_ref[...],
                preferred_element_type=jnp.float32) + b_ref[...]
    if leaky:                                      # LeakyReLU(0.2)
        y = jnp.where(y >= 0, y, 0.2 * y)
    o_ref[...] = y.astype(o_ref.dtype)


def _gemm_kernel_multi(w_ref, x_ref, b_ref, o_ref, acc_ref, *, leaky):
    """Multi-K-step GEMM with f32 VMEM accumulator; bias+LeakyReLU in epilogue."""
    @pl.when(pl.program_id(1) == 0)
    def _():
        acc_ref[...] = jnp.zeros_like(acc_ref)

    acc_ref[...] += jnp.dot(w_ref[...], x_ref[...],
                            preferred_element_type=jnp.float32)

    @pl.when(pl.program_id(1) == pl.num_programs(1) - 1)
    def _():
        y = acc_ref[...] + b_ref[...]
        if leaky:
            y = jnp.where(y >= 0, y, 0.2 * y)
        o_ref[...] = y.astype(o_ref.dtype)


def conv_gemm(wmat, cols, bias, *, leaky):
    """(Cout, K) @ (K, M) + bias, optional LeakyReLU(0.2).

    Lane-dense bf16 output (Cout, M); bf16 operands, f32 accumulation; M tiled
    & pipelined ("parallel" for megacore), K is the reduction axis when tiled.
    """
    Cout, K = wmat.shape
    M = cols.shape[1]
    M_pad = _round_up(M, 128)

    if K <= 2048:
        K_pad = _round_up(K, 16)
        tK = K_pad                      # weights stay fully VMEM-resident
    else:
        tK = 512
        K_pad = _round_up(K, tK)
    n_k = K_pad // tK

    # Pick the largest lane-dense M tile that fits the VMEM budget, preferring
    # n_m >= 2 so the "parallel" M axis can be split across v7x's two cores.
    def vmem_use(t):
        return (2 * tK * t * 2                 # double-buffered X tile (bf16)
                + 2 * Cout * tK * 2            # double-buffered W tile (bf16)
                + 2 * Cout * t * 2             # double-buffered out tile (bf16)
                + (Cout * t * 4 if n_k > 1 else 0))   # f32 accumulator
    cands = [t for t in (2048, 1024, 512, 256, 128) if M_pad % t == 0]
    fitting = [t for t in cands if vmem_use(t) <= _TILE_VMEM_BUDGET] or [cands[-1]]
    multi = [t for t in fitting if M_pad // t >= 2]
    tM = (multi or fitting)[0]
    n_m = M_pad // tM

    w_p = jnp.pad(wmat.astype(jnp.bfloat16), ((0, 0), (0, K_pad - K)))
    x_p = jnp.pad(cols.astype(jnp.bfloat16), ((0, K_pad - K), (0, M_pad - M)))
    b_p = bias.reshape(Cout, 1).astype(jnp.float32)

    cost = pl.CostEstimate(flops=2 * Cout * K * M, transcendentals=0,
                           bytes_accessed=2 * (Cout * K + K * M + Cout * M))

    if n_k == 1:
        out = pl.pallas_call(
            functools.partial(_gemm_kernel_single, leaky=leaky),
            out_shape=jax.ShapeDtypeStruct((Cout, M_pad), jnp.bfloat16),
            grid=(n_m,),
            in_specs=[pl.BlockSpec((Cout, K_pad), lambda m: (0, 0)),
                      pl.BlockSpec((K_pad, tM), lambda m: (0, m)),
                      pl.BlockSpec((Cout, 1), lambda m: (0, 0))],
            out_specs=pl.BlockSpec((Cout, tM), lambda m: (0, m)),
            compiler_params=pltpu.CompilerParams(
                dimension_semantics=("parallel",),
                vmem_limit_bytes=_VMEM_LIMIT),
            cost_estimate=cost,
        )(w_p, x_p, b_p)
    else:
        out = pl.pallas_call(
            functools.partial(_gemm_kernel_multi, leaky=leaky),
            out_shape=jax.ShapeDtypeStruct((Cout, M_pad), jnp.bfloat16),
            grid=(n_m, n_k),
            in_specs=[pl.BlockSpec((Cout, tK), lambda m, k: (0, k)),
                      pl.BlockSpec((tK, tM), lambda m, k: (k, m)),
                      pl.BlockSpec((Cout, 1), lambda m, k: (0, 0))],
            out_specs=pl.BlockSpec((Cout, tM), lambda m, k: (0, m)),
            scratch_shapes=[pltpu.VMEM((Cout, tM), jnp.float32)],
            compiler_params=pltpu.CompilerParams(
                dimension_semantics=("parallel", "arbitrary"),
                vmem_limit_bytes=_VMEM_LIMIT),
            cost_estimate=cost,
        )(w_p, x_p, b_p)
    return out[:, :M]


# ----------------------------- convolution -----------------------------

def _conv_cols(h, kh, kw, stride, padding):
    """Planar (C,B,H,W) -> im2col^T columns (kh*kw*C, B*Ho*Wo), in h's dtype.

    Built directly in bf16 (activations are bf16) so the expanded matrix is
    materialized exactly once.
    """
    C, B, H, W = h.shape
    Ho = (H + 2 * padding - kh) // stride + 1
    Wo = (W + 2 * padding - kw) // stride + 1
    hp = jnp.pad(h, ((0, 0), (0, 0), (padding, padding), (padding, padding)))
    taps = [hp[:, :, i::stride, j::stride][:, :, :Ho, :Wo]
            for i in range(kh) for j in range(kw)]
    cols = jnp.stack(taps, axis=0).reshape(kh * kw * C, B * Ho * Wo)
    return cols, Ho, Wo


def conv2d_planar(h, w, b, *, stride, padding, leaky):
    """PyTorch-semantics Conv2d. h:(Cin,B,H,W) bf16, w OIHW f32, b:(Cout,)."""
    Cin, B, _, _ = h.shape
    Cout, _, kh, kw = w.shape
    cols, Ho, Wo = _conv_cols(h, kh, kw, stride, padding)
    wmat = w.transpose(0, 2, 3, 1).reshape(Cout, kh * kw * Cin)
    out = conv_gemm(wmat, cols, b, leaky=leaky)           # (Cout, B*Ho*Wo) bf16
    return out.reshape(Cout, B, Ho, Wo)


# ----------------------------- avg-pool downsample -----------------------------

def _avgpool_kernel(x_ref, rc_ref, o_ref, *, Ho, Wo):
    # x_ref: (4, TR, Ho+1, Wo+1) -- 4 row/col parities of TR padded planes.
    s = jnp.zeros(o_ref.shape, jnp.float32)
    for di in range(3):
        for dj in range(3):
            pi, gi = di % 2, di // 2
            pj, gj = dj % 2, dj // 2
            s = s + x_ref[pi * 2 + pj, :, gi:gi + Ho, gj:gj + Wo].astype(jnp.float32)
    # count_include_pad=False handled by a precomputed reciprocal-count plane.
    o_ref[...] = s * rc_ref[...]


def downsample_planar(x):
    """F.avg_pool2d(x, 3, stride=2, padding=1, count_include_pad=False), planar."""
    C, B, H, W = x.shape
    assert H % 2 == 0 and W % 2 == 0
    Ho, Wo = H // 2, W // 2
    R = C * B
    xp = jnp.pad(x.reshape(R, H, W), ((0, 0), (1, 1), (1, 1)))
    # Split padded rows/cols into (coarse, parity) and move parity up front so
    # the kernel addresses all 9 stride-2 taps with static slices.
    xr = xp.reshape(R, Ho + 1, 2, Wo + 1, 2).transpose(2, 4, 0, 1, 3)
    xr = xr.reshape(4, R, Ho + 1, Wo + 1)
    # Reciprocal counts (only first output row/col see 2 valid taps per axis).
    rid = jnp.arange(Ho)
    cid = jnp.arange(Wo)
    cnt = (jnp.where(rid == 0, 2.0, 3.0)[:, None]
           * jnp.where(cid == 0, 2.0, 3.0)[None, :])
    rcnt = (1.0 / cnt).astype(jnp.float32).reshape(1, Ho, Wo)
    # Batch TR planes per grid step (amortizes per-step pipeline overhead).
    TR = next(t for t in range(min(R, 64), 0, -1) if R % t == 0)
    out = pl.pallas_call(
        functools.partial(_avgpool_kernel, Ho=Ho, Wo=Wo),
        out_shape=jax.ShapeDtypeStruct((R, Ho, Wo), jnp.float32),
        grid=(R // TR,),
        in_specs=[pl.BlockSpec((4, TR, Ho + 1, Wo + 1), lambda r: (0, r, 0, 0)),
                  pl.BlockSpec((1, Ho, Wo), lambda r: (0, 0, 0))],
        out_specs=pl.BlockSpec((TR, Ho, Wo), lambda r: (r, 0, 0)),
        compiler_params=pltpu.CompilerParams(
            dimension_semantics=("parallel",),
            vmem_limit_bytes=_VMEM_LIMIT),
    )(xr, rcnt)
    return out.reshape(C, B, Ho, Wo)


# ----------------------------- fused heads -----------------------------

def _heads_kernel(x_ref, sel_ref, pw_ref, pb_ref, cw_ref, cb_ref,
                  cam_ref, patch_ref, pooled_ref, acc_ref, *, inv_hw):
    @pl.when(pl.program_id(0) == 0)
    def _():
        acc_ref[...] = jnp.zeros_like(acc_ref)

    x = x_ref[...]                                        # (C, tM) bf16
    # 1x1 "patch" conv: (1, C) @ (C, tM) -> lane-dense (1, tM) f32.
    patch_ref[...] = (jnp.dot(pw_ref[...], x,
                              preferred_element_type=jnp.float32) + pb_ref[...])
    # Global average pool as an MXU matmul against a block-diagonal selector.
    acc_ref[...] += jnp.dot(x, sel_ref[...],
                            preferred_element_type=jnp.float32)

    @pl.when(pl.program_id(0) == pl.num_programs(0) - 1)
    def _():
        pooled = acc_ref[...] * inv_hw                    # (C, B) f32
        pooled_ref[...] = pooled
        # CAM linear head on the pooled feature: (D, C) @ (C, B).
        cam_ref[...] = (jnp.dot(cw_ref[...], pooled,
                                preferred_element_type=jnp.float32) + cb_ref[...])


def heads(h, cam_w, cam_b, patch_w, patch_b):
    """Fused GAP + CAM Linear + 1x1 patch conv; reads the feature map once.

    h planar (C,B,Ho,Wo) bf16; cam_w (D,C) [PyTorch Linear layout]; cam_b (D,);
    patch_w (1,C,1,1); patch_b (1,).  Tiled along M (pipelined), pooled/cam
    finalized under pl.when(last).
    """
    C, B, Ho, Wo = h.shape
    HW = Ho * Wo
    M = B * HW
    D = cam_w.shape[0]
    M_pad = _round_up(M, 128)
    tM = next(t for t in (1024, 512, 256, 128) if M_pad % t == 0)
    n_m = M_pad // tM

    x = jnp.pad(h.reshape(C, M).astype(jnp.bfloat16), ((0, 0), (0, M_pad - M)))
    # Block-diagonal averaging selector: sel[b*HW + j, b] = 1 for valid columns.
    pos = jnp.arange(M_pad)
    sel = ((pos[:, None] // HW == jnp.arange(B)[None, :])
           & (pos[:, None] < M)).astype(jnp.bfloat16)

    cam, patch, pooled = pl.pallas_call(
        functools.partial(_heads_kernel, inv_hw=1.0 / HW),
        out_shape=(jax.ShapeDtypeStruct((D, B), jnp.float32),
                   jax.ShapeDtypeStruct((1, M_pad), jnp.float32),
                   jax.ShapeDtypeStruct((C, B), jnp.float32)),
        grid=(n_m,),
        in_specs=[pl.BlockSpec((C, tM), lambda m: (0, m)),
                  pl.BlockSpec((tM, B), lambda m: (m, 0)),
                  pl.BlockSpec((1, C), lambda m: (0, 0)),
                  pl.BlockSpec((1, 1), lambda m: (0, 0)),
                  pl.BlockSpec((D, C), lambda m: (0, 0)),
                  pl.BlockSpec((D, 1), lambda m: (0, 0))],
        out_specs=(pl.BlockSpec((D, B), lambda m: (0, 0)),
                   pl.BlockSpec((1, tM), lambda m: (0, m)),
                   pl.BlockSpec((C, B), lambda m: (0, 0))),
        scratch_shapes=[pltpu.VMEM((C, B), jnp.float32)],
        compiler_params=pltpu.CompilerParams(
            dimension_semantics=("arbitrary",),
            vmem_limit_bytes=_VMEM_LIMIT),
    )(x, sel,
      patch_w.reshape(1, C).astype(jnp.bfloat16),
      patch_b.reshape(1, 1).astype(jnp.float32),
      cam_w.astype(jnp.float32),
      cam_b.reshape(D, 1).astype(jnp.float32))
    patch = patch[:, :M].reshape(1, B, Ho, Wo)
    return cam.T, patch, pooled


# ----------------------------- Discriminator -----------------------------
# TODO(synk): ActConvDown internals are not in the provided snippet;
# reconstructed here as a stack of stride-2 4x4 convs + LeakyReLU(0.2), a CAM
# linear head on the pooled last feature, and a 1x1 patch-output conv.

def init_params(key, input_ch=3, domain_num=2):
    base_dim = NETD_PARAMS['base_dim']
    netD_num = NETD_PARAMS['netD_num']
    n_layers = NETD_PARAMS['n_layers']

    def rnd(k, shape, scale=0.05):
        return jax.random.normal(k, shape, jnp.float32) * scale

    params = {}
    output_dim = base_dim
    for d in range(1, netD_num + 1):
        pd = {'convs': []}
        cin = input_ch
        for l in range(n_layers):
            cout = base_dim * (2 ** l)
            key, kw_, kb_ = jax.random.split(key, 3)
            pd['convs'].append((rnd(kw_, (cout, cin, 4, 4)), rnd(kb_, (cout,))))
            cin = cout
        output_dim = cin
        key, k1, k2, k3, k4 = jax.random.split(key, 5)
        pd['cam_w'] = rnd(k1, (domain_num, output_dim))   # PyTorch Linear (out,in)
        pd['cam_b'] = rnd(k2, (domain_num,))
        pd['patch_w'] = rnd(k3, (1, output_dim, 1, 1))
        pd['patch_b'] = rnd(k4, (1,))
        params[f'netD_{d}'] = pd
    key, k1, k2 = jax.random.split(key, 3)
    params['domain_fc_w'] = rnd(k1, (domain_num, output_dim))
    params['domain_fc_b'] = rnd(k2, (domain_num,))
    return params


def act_conv_down(pd, h_planar):
    feats = []
    h = h_planar
    for (w, b) in pd['convs']:
        h = conv2d_planar(h, w, b, stride=2, padding=1, leaky=True)
        feats.append(h)
    cam, patch, pooled = heads(h, pd['cam_w'], pd['cam_b'],
                               pd['patch_w'], pd['patch_b'])
    return feats, cam, patch, pooled


def discriminator_forward(params, x):
    netD_num = NETD_PARAMS['netD_num']
    # NCHW -> planar (C, B, H, W) once, at the module boundary.
    xpl = jnp.transpose(x, (1, 0, 2, 3))
    # The original module downsamples the *original* input once for every i>1.
    x_ds = downsample_planar(xpl) if netD_num > 1 else None
    feats_all, cam_logit, adv_patch = [], [], []
    pooled_last = None
    for i in range(1, netD_num + 1):
        h1 = xpl if i == 1 else x_ds
        h1 = h1.astype(jnp.bfloat16)
        feats, cam, patch, pooled = act_conv_down(params[f'netD_{i}'], h1)
        feats_all.append(feats)
        cam_logit.append(cam)
        adv_patch.append(patch)
        pooled_last = pooled
    # domain_fc on the pooled feature of the last netD's last layer: the
    # (D, C) @ (C, B) matmul is trivial -> plain jnp, no extra kernel launch.
    pred_class = pooled_last.T @ params['domain_fc_w'].T + params['domain_fc_b'][None, :]
    # Convert returned tensors back to PyTorch NCHW at the boundary only.
    feats_nchw = [[f.transpose(1, 0, 2, 3) for f in fs] for fs in feats_all]
    adv_patch_nchw = [p.transpose(1, 0, 2, 3) for p in adv_patch]
    # Munch(...) replaced with a plain dict
    return dict(feats=feats_nchw, cam_logit=cam_logit,
                adv_patch=adv_patch_nchw, pred_class=pred_class)


# ----------------------------- Pure-JAX reference -----------------------------

def _conv_ref(x, w, b, stride, padding, leaky):
    y = lax.conv_general_dilated(
        x, w, (stride, stride), [(padding, padding)] * 2,
        dimension_numbers=('NCHW', 'OIHW', 'NCHW'),
        precision=lax.Precision.HIGHEST)
    y = y + b[None, :, None, None]
    if leaky:
        y = jnp.where(y >= 0, y, 0.2 * y)
    return y


def _downsample_ref(x):
    pads = [(0, 0), (0, 0), (1, 1), (1, 1)]
    s = lax.reduce_window(x, 0.0, lax.add, (1, 1, 3, 3), (1, 1, 2, 2), pads)
    c = lax.reduce_window(jnp.ones_like(x), 0.0, lax.add,
                          (1, 1, 3, 3), (1, 1, 2, 2), pads)
    return s / c


def _gap_fc_ref(x, w, b):
    pooled = jnp.mean(x, axis=(2, 3))
    return pooled @ w.T + b[None, :]


def _ref_forward(params, x):
    feats, cam_logit, adv_patch = [], [], []
    for i in range(1, NETD_PARAMS['netD_num'] + 1):
        h1 = x if i == 1 else _downsample_ref(x)
        pd = params[f'netD_{i}']
        fs, h = [], h1
        for (w, b) in pd['convs']:
            h = _conv_ref(h, w, b, 2, 1, True)
            fs.append(h)
        feats.append(fs)
        cam_logit.append(_gap_fc_ref(h, pd['cam_w'], pd['cam_b']))
        adv_patch.append(_conv_ref(h, pd['patch_w'], pd['patch_b'], 1, 0, False))
    pred_class = _gap_fc_ref(feats[-1][-1],
                             params['domain_fc_w'], params['domain_fc_b'])
    return dict(feats=feats, cam_logit=cam_logit,
                adv_patch=adv_patch, pred_class=pred_class)


# ----------------------------- Main -----------------------------

if __name__ == "__main__":
    key = jax.random.PRNGKey(0)
    kx, kp = jax.random.split(key)
    B, C, H = 2, 3, 32                      # small shapes; img_size = 32
    x = jax.random.normal(kx, (B, C, H, H), jnp.float32)
    params = init_params(kp, input_ch=C, domain_num=2)

    fwd = jax.jit(discriminator_forward)
    out = fwd(params, x)
    jax.block_until_ready(out['pred_class'])

    ref = _ref_forward(params, x)

    # Direct check of the avg-pool downsample kernel (f32 arithmetic).
    ds = downsample_planar(jnp.transpose(x, (1, 0, 2, 3))).transpose(1, 0, 2, 3)
    assert jnp.allclose(ds, _downsample_ref(x), rtol=1e-5, atol=1e-5)

    # bf16 operands + bf16 activations vs f32 HIGHEST reference -> loose tol.
    rtol, atol = 2e-2, 2e-2
    assert out['pred_class'].shape == (B, 2)
    assert jnp.allclose(out['pred_class'], ref['pred_class'], rtol=rtol, atol=atol)
    for a, b_ in zip(out['adv_patch'], ref['adv_patch']):
        assert a.shape == b_.shape
        assert jnp.allclose(a, b_, rtol=rtol, atol=atol)
    for a, b_ in zip(out['cam_logit'], ref['cam_logit']):
        assert jnp.allclose(a, b_, rtol=rtol, atol=atol)
    for fa, fb in zip(out['feats'], ref['feats']):
        for a, b_ in zip(fa, fb):
            assert a.shape == b_.shape
            assert jnp.allclose(a.astype(jnp.float32), b_, rtol=rtol, atol=atol)

    print("KERNEL_OK")
</pallas_src>

<mosaic_0001>
module attributes {stable_mosaic.version = 11 : i64} {
  func.func @_avgpool_kernel(%arg0: i32, %arg1: memref<4x6x17x17xf32, #tpu.memory_space<vmem>>, %arg2: memref<1x16x16xf32, #tpu.memory_space<vmem>>, %arg3: memref<6x16x16xf32, #tpu.memory_space<vmem>>) attributes {dimension_semantics = [#tpu.dimension_semantics<parallel>], iteration_bounds = array<i64: 1>, scalar_prefetch = 0 : i64, scratch_operands = 0 : i64, tpu.core_type = #tpu.core_type<tc>, window_params = [{transform_indices = @transform_0, window_bounds = array<i64: 4, 6, 17, 17>}, {pipeline_mode = #tpu.pipeline_mode<synchronous>, transform_indices = @transform_1, window_bounds = array<i64: 1, 16, 16>}, {transform_indices = @transform_2, window_bounds = array<i64: 6, 16, 16>}]} {
    %cst = arith.constant 0.000000e+00 : f32
    %0 = vector.broadcast %cst : f32 to vector<6x16x16xf32>
    %c0 = arith.constant 0 : index
    %c0_0 = arith.constant 0 : index
    %c0_1 = arith.constant 0 : index
    %c0_2 = arith.constant 0 : index
    %1 = vector.load %arg1[%c0, %c0_0, %c0_1, %c0_2] : memref<4x6x17x17xf32, #tpu.memory_space<vmem>>, vector<1x6x16x16xf32>
    %2 = vector.shape_cast %1 : vector<1x6x16x16xf32> to vector<6x16x16xf32>
    %3 = arith.addf %0, %2 : vector<6x16x16xf32>
    %c1 = arith.constant 1 : index
    %c0_3 = arith.constant 0 : index
    %c0_4 = arith.constant 0 : index
    %c0_5 = arith.constant 0 : index
    %4 = vector.load %arg1[%c1, %c0_3, %c0_4, %c0_5] : memref<4x6x17x17xf32, #tpu.memory_space<vmem>>, vector<1x6x16x16xf32>
    %5 = vector.shape_cast %4 : vector<1x6x16x16xf32> to vector<6x16x16xf32>
    %6 = arith.addf %3, %5 : vector<6x16x16xf32>
    %c0_6 = arith.constant 0 : index
    %c0_7 = arith.constant 0 : index
    %c0_8 = arith.constant 0 : index
    %c1_9 = arith.constant 1 : index
    %7 = vector.load %arg1[%c0_6, %c0_7, %c0_8, %c1_9] : memref<4x6x17x17xf32, #tpu.memory_space<vmem>>, vector<1x6x16x16xf32>
    %8 = vector.shape_cast %7 : vector<1x6x16x16xf32> to vector<6x16x16xf32>
    %9 = arith.addf %6, %8 : vector<6x16x16xf32>
    %c2 = arith.constant 2 : index
    %c0_10 = arith.constant 0 : index
    %c0_11 = arith.constant 0 : index
    %c0_12 = arith.constant 0 : index
    %10 = vector.load %arg1[%c2, %c0_10, %c0_11, %c0_12] : memref<4x6x17x17xf32, #tpu.memory_space<vmem>>, vector<1x6x16x16xf32>
    %11 = vector.shape_cast %10 : vector<1x6x16x16xf32> to vector<6x16x16xf32>
    %12 = arith.addf %9, %11 : vector<6x16x16xf32>
    %c3 = arith.constant 3 : index
    %c0_13 = arith.constant 0 : index
    %c0_14 = arith.constant 0 : index
    %c0_15 = arith.constant 0 : index
    %13 = vector.load %arg1[%c3, %c0_13, %c0_14, %c0_15] : memref<4x6x17x17xf32, #tpu.memory_space<vmem>>, vector<1x6x16x16xf32>
    %14 = vector.shape_cast %13 : vector<1x6x16x16xf32> to vector<6x16x16xf32>
    %15 = arith.addf %12, %14 : vector<6x16x16xf32>
    %c2_16 = arith.constant 2 : index
    %c0_17 = arith.constant 0 : index
    %c0_18 = arith.constant 0 : index
    %c1_19 = arith.constant 1 : index
    %16 = vector.load %arg1[%c2_16, %c0_17, %c0_18, %c1_19] : memref<4x6x17x17xf32, #tpu.memory_space<vmem>>, vector<1x6x16x16xf32>
    %17 = vector.shape_cast %16 : vector<1x6x16x16xf32> to vector<6x16x16xf32>
    %18 = arith.addf %15, %17 : vector<6x16x16xf32>
    %c0_20 = arith.constant 0 : index
    %c0_21 = arith.constant 0 : index
    %c1_22 = arith.constant 1 : index
    %c0_23 = arith.constant 0 : index
    %19 = vector.load %arg1[%c0_20, %c0_21, %c1_22, %c0_23] : memref<4x6x17x17xf32, #tpu.memory_space<vmem>>, vector<1x6x16x16xf32>
    %20 = vector.shape_cast %19 : vector<1x6x16x16xf32> to vector<6x16x16xf32>
    %21 = arith.addf %18, %20 : vector<6x16x16xf32>
    %c1_24 = arith.constant 1 : index
    %c0_25 = arith.constant 0 : index
    %c1_26 = arith.constant 1 : index
    %c0_27 = arith.constant 0 : index
    %22 = vector.load %arg1[%c1_24, %c0_25, %c1_26, %c0_27] : memref<4x6x17x17xf32, #tpu.memory_space<vmem>>, vector<1x6x16x16xf32>
    %23 = vector.shape_cast %22 : vector<1x6x16x16xf32> to vector<6x16x16xf32>
    %24 = arith.addf %21, %23 : vector<6x16x16xf32>
    %c0_28 = arith.constant 0 : index
    %c0_29 = arith.constant 0 : index
    %c1_30 = arith.constant 1 : index
    %c1_31 = arith.constant 1 : index
    %25 = vector.load %arg1[%c0_28, %c0_29, %c1_30, %c1_31] : memref<4x6x17x17xf32, #tpu.memory_space<vmem>>, vector<1x6x16x16xf32>
    %26 = vector.shape_cast %25 : vector<1x6x16x16xf32> to vector<6x16x16xf32>
    %27 = arith.addf %24, %26 : vector<6x16x16xf32>
    %c0_32 = arith.constant 0 : index
    %c0_33 = arith.constant 0 : index
    %c0_34 = arith.constant 0 : index
    %28 = vector.load %arg2[%c0_32, %c0_33, %c0_34] : memref<1x16x16xf32, #tpu.memory_space<vmem>>, vector<1x16x16xf32>
    %29 = vector.broadcast %28 : vector<1x16x16xf32> to vector<6x16x16xf32>
    %30 = arith.mulf %27, %29 : vector<6x16x16xf32>
    %c0_35 = arith.constant 0 : index
    %c0_36 = arith.constant 0 : index
    %c0_37 = arith.constant 0 : index
    %31 = vector.load %arg3[%c0_35, %c0_36, %c0_37] : memref<6x16x16xf32, #tpu.memory_space<vmem>>, vector<6x16x16xf32>
    tpu.vector_store %arg3[%c0_35, %c0_36, %c0_37], %30 {strides = array<i32>} : memref<6x16x16xf32, #tpu.memory_space<vmem>>, vector<6x16x16xf32>,
    return
  }
  func.func @transform_0(%arg0: i32) -> (i32, i32, i32, i32) {
    %c0_i32 = arith.constant 0 : i32
    %c0_i32_0 = arith.constant 0 : i32
    %c0_i32_1 = arith.constant 0 : i32
    %c0_i32_2 = arith.constant 0 : i32
    return %c0_i32, %arg0, %c0_i32_0, %c0_i32_1 : i32, i32, i32, i32
  }
  func.func @transform_1(%arg0: i32) -> (i32, i32, i32) {
    %c0_i32 = arith.constant 0 : i32
    %c0_i32_0 = arith.constant 0 : i32
    %c0_i32_1 = arith.constant 0 : i32
    %c0_i32_2 = arith.constant 0 : i32
    return %c0_i32, %c0_i32_0, %c0_i32_1 : i32, i32, i32
  }
  func.func @transform_2(%arg0: i32) -> (i32, i32, i32) {
    %c0_i32 = arith.constant 0 : i32
    %c0_i32_0 = arith.constant 0 : i32
    %c0_i32_1 = arith.constant 0 : i32
    return %arg0, %c0_i32, %c0_i32_0 : i32, i32, i32
  }
}

module attributes {stable_mosaic.version = 11 : i64} {
  func.func @_gemm_kernel_single(%arg0: i32, %arg1: memref<8x48xbf16, #tpu.memory_space<vmem>>, %arg2: memref<48x128xbf16, #tpu.memory_space<vmem>>, %arg3: memref<8x1xf32, #tpu.memory_space<vmem>>, %arg4: memref<8x128xbf16, #tpu.memory_space<vmem>>) attributes {dimension_semantics = [#tpu.dimension_semantics<parallel>], iteration_bounds = array<i64: 1>, scalar_prefetch = 0 : i64, scratch_operands = 0 : i64, tpu.core_type = #tpu.core_type<tc>, window_params = [{pipeline_mode = #tpu.pipeline_mode<synchronous>, transform_indices = @transform_0, window_bounds = array<i64: 8, 48>}, {transform_indices = @transform_1, window_bounds = array<i64: 48, 128>}, {pipeline_mode = #tpu.pipeline_mode<synchronous>, transform_indices = @transform_2, window_bounds = array<i64: 8, 1>}, {transform_indices = @transform_3, window_bounds = array<i64: 8, 128>}]} {
    %c0 = arith.constant 0 : index
    %c0_0 = arith.constant 0 : index
    %0 = vector.load %arg1[%c0, %c0_0] : memref<8x48xbf16, #tpu.memory_space<vmem>>, vector<8x48xbf16>
    %c0_1 = arith.constant 0 : index
    %c0_2 = arith.constant 0 : index
    %1 = vector.load %arg2[%c0_1, %c0_2] : memref<48x128xbf16, #tpu.memory_space<vmem>>, vector<48x128xbf16>
    %cst = arith.constant dense<0.000000e+00> : vector<8x128xf32>
    %2 = tpu.matmul %0, %1, %cst {dimension_numbers = #tpu.dot_dimension_numbers<[1], [0], [0], [1], [0, 0, 1, 1], [], []>} : vector<8x48xbf16>, vector<48x128xbf16>, vector<8x128xf32> -> vector<8x128xf32>
    %c0_3 = arith.constant 0 : index
    %c0_4 = arith.constant 0 : index
    %3 = vector.load %arg3[%c0_3, %c0_4] : memref<8x1xf32, #tpu.memory_space<vmem>>, vector<8x1xf32>
    %4 = vector.broadcast %3 : vector<8x1xf32> to vector<8x128xf32>
    %5 = arith.addf %2, %4 : vector<8x128xf32>
    %cst_5 = arith.constant 0.000000e+00 : f32
    %6 = vector.broadcast %cst_5 : f32 to vector<8x128xf32>
    %7 = arith.cmpf oge, %5, %6 : vector<8x128xf32>
    %cst_6 = arith.constant 2.000000e-01 : f32
    %8 = vector.broadcast %cst_6 : f32 to vector<8x128xf32>
    %9 = arith.mulf %8, %5 : vector<8x128xf32>
    %10 = arith.select %7, %5, %9 : vector<8x128xi1>, vector<8x128xf32>
    %11 = arith.truncf %10 : vector<8x128xf32> to vector<8x128xbf16>
    %c0_7 = arith.constant 0 : index
    %c0_8 = arith.constant 0 : index
    %12 = vector.load %arg4[%c0_7, %c0_8] : memref<8x128xbf16, #tpu.memory_space<vmem>>, vector<8x128xbf16>
    tpu.vector_store %arg4[%c0_7, %c0_8], %11 {strides = array<i32>} : memref<8x128xbf16, #tpu.memory_space<vmem>>, vector<8x128xbf16>,
    return
  }
  func.func @transform_0(%arg0: i32) -> (i32, i32) {
    %c0_i32 = arith.constant 0 : i32
    %c0_i32_0 = arith.constant 0 : i32
    %c0_i32_1 = arith.constant 0 : i32
    return %c0_i32, %c0_i32_0 : i32, i32
  }
  func.func @transform_1(%arg0: i32) -> (i32, i32) {
    %c0_i32 = arith.constant 0 : i32
    %c0_i32_0 = arith.constant 0 : i32
    return %c0_i32, %arg0 : i32, i32
  }
  func.func @transform_2(%arg0: i32) -> (i32, i32) {
    %c0_i32 = arith.constant 0 : i32
    %c0_i32_0 = arith.constant 0 : i32
    %c0_i32_1 = arith.constant 0 : i32
    return %c0_i32, %c0_i32_0 : i32, i32
  }
  func.func @transform_3(%arg0: i32) -> (i32, i32) {
    %c0_i32 = arith.constant 0 : i32
    %c0_i32_0 = arith.constant 0 : i32
    return %c0_i32, %arg0 : i32, i32
  }
}

module attributes {stable_mosaic.version = 11 : i64} {
  func.func @_gemm_kernel_single(%arg0: i32, %arg1: memref<16x128xbf16, #tpu.memory_space<vmem>>, %arg2: memref<128x128xbf16, #tpu.memory_space<vmem>>, %arg3: memref<16x1xf32, #tpu.memory_space<vmem>>, %arg4: memref<16x128xbf16, #tpu.memory_space<vmem>>) attributes {dimension_semantics = [#tpu.dimension_semantics<parallel>], iteration_bounds = array<i64: 1>, scalar_prefetch = 0 : i64, scratch_operands = 0 : i64, tpu.core_type = #tpu.core_type<tc>, window_params = [{pipeline_mode = #tpu.pipeline_mode<synchronous>, transform_indices = @transform_0, window_bounds = array<i64: 16, 128>}, {transform_indices = @transform_1, window_bounds = array<i64: 128, 128>}, {pipeline_mode = #tpu.pipeline_mode<synchronous>, transform_indices = @transform_2, window_bounds = array<i64: 16, 1>}, {transform_indices = @transform_3, window_bounds = array<i64: 16, 128>}]} {
    %c0 = arith.constant 0 : index
    %c0_0 = arith.constant 0 : index
    %0 = vector.load %arg1[%c0, %c0_0] : memref<16x128xbf16, #tpu.memory_space<vmem>>, vector<16x128xbf16>
    %c0_1 = arith.constant 0 : index
    %c0_2 = arith.constant 0 : index
    %1 = vector.load %arg2[%c0_1, %c0_2] : memref<128x128xbf16, #tpu.memory_space<vmem>>, vector<128x128xbf16>
    %cst = arith.constant dense<0.000000e+00> : vector<16x128xf32>
    %2 = tpu.matmul %0, %1, %cst {dimension_numbers = #tpu.dot_dimension_numbers<[1], [0], [0], [1], [0, 0, 1, 1], [], []>} : vector<16x128xbf16>, vector<128x128xbf16>, vector<16x128xf32> -> vector<16x128xf32>
    %c0_3 = arith.constant 0 : index
    %c0_4 = arith.constant 0 : index
    %3 = vector.load %arg3[%c0_3, %c0_4] : memref<16x1xf32, #tpu.memory_space<vmem>>, vector<16x1xf32>
    %4 = vector.broadcast %3 : vector<16x1xf32> to vector<16x128xf32>
    %5 = arith.addf %2, %4 : vector<16x128xf32>
    %cst_5 = arith.constant 0.000000e+00 : f32
    %6 = vector.broadcast %cst_5 : f32 to vector<16x128xf32>
    %7 = arith.cmpf oge, %5, %6 : vector<16x128xf32>
    %cst_6 = arith.constant 2.000000e-01 : f32
    %8 = vector.broadcast %cst_6 : f32 to vector<16x128xf32>
    %9 = arith.mulf %8, %5 : vector<16x128xf32>
    %10 = arith.select %7, %5, %9 : vector<16x128xi1>, vector<16x128xf32>
    %11 = arith.truncf %10 : vector<16x128xf32> to vector<16x128xbf16>
    %c0_7 = arith.constant 0 : index
    %c0_8 = arith.constant 0 : index
    %12 = vector.load %arg4[%c0_7, %c0_8] : memref<16x128xbf16, #tpu.memory_space<vmem>>, vector<16x128xbf16>
    tpu.vector_store %arg4[%c0_7, %c0_8], %11 {strides = array<i32>} : memref<16x128xbf16, #tpu.memory_space<vmem>>, vector<16x128xbf16>,
    return
  }
  func.func @transform_0(%arg0: i32) -> (i32, i32) {
    %c0_i32 = arith.constant 0 : i32
    %c0_i32_0 = arith.constant 0 : i32
    %c0_i32_1 = arith.constant 0 : i32
    return %c0_i32, %c0_i32_0 : i32, i32
  }
  func.func @transform_1(%arg0: i32) -> (i32, i32) {
    %c0_i32 = arith.constant 0 : i32
    %c0_i32_0 = arith.constant 0 : i32
    return %c0_i32, %arg0 : i32, i32
  }
  func.func @transform_2(%arg0: i32) -> (i32, i32) {
    %c0_i32 = arith.constant 0 : i32
    %c0_i32_0 = arith.constant 0 : i32
    %c0_i32_1 = arith.constant 0 : i32
    return %c0_i32, %c0_i32_0 : i32, i32
  }
  func.func @transform_3(%arg0: i32) -> (i32, i32) {
    %c0_i32 = arith.constant 0 : i32
    %c0_i32_0 = arith.constant 0 : i32
    return %c0_i32, %arg0 : i32, i32
  }
}

module attributes {stable_mosaic.version = 11 : i64} {
  func.func @_gemm_kernel_single(%arg0: i32, %arg1: memref<32x256xbf16, #tpu.memory_space<vmem>>, %arg2: memref<256x128xbf16, #tpu.memory_space<vmem>>, %arg3: memref<32x1xf32, #tpu.memory_space<vmem>>, %arg4: memref<32x128xbf16, #tpu.memory_space<vmem>>) attributes {dimension_semantics = [#tpu.dimension_semantics<parallel>], iteration_bounds = array<i64: 1>, scalar_prefetch = 0 : i64, scratch_operands = 0 : i64, tpu.core_type = #tpu.core_type<tc>, window_params = [{pipeline_mode = #tpu.pipeline_mode<synchronous>, transform_indices = @transform_0, window_bounds = array<i64: 32, 256>}, {transform_indices = @transform_1, window_bounds = array<i64: 256, 128>}, {pipeline_mode = #tpu.pipeline_mode<synchronous>, transform_indices = @transform_2, window_bounds = array<i64: 32, 1>}, {transform_indices = @transform_3, window_bounds = array<i64: 32, 128>}]} {
    %c0 = arith.constant 0 : index
    %c0_0 = arith.constant 0 : index
    %0 = vector.load %arg1[%c0, %c0_0] : memref<32x256xbf16, #tpu.memory_space<vmem>>, vector<32x256xbf16>
    %c0_1 = arith.constant 0 : index
    %c0_2 = arith.constant 0 : index
    %1 = vector.load %arg2[%c0_1, %c0_2] : memref<256x128xbf16, #tpu.memory_space<vmem>>, vector<256x128xbf16>
    %cst = arith.constant dense<0.000000e+00> : vector<32x128xf32>
    %2 = tpu.matmul %0, %1, %cst {dimension_numbers = #tpu.dot_dimension_numbers<[1], [0], [0], [1], [0, 0, 1, 1], [], []>} : vector<32x256xbf16>, vector<256x128xbf16>, vector<32x128xf32> -> vector<32x128xf32>
    %c0_3 = arith.constant 0 : index
    %c0_4 = arith.constant 0 : index
    %3 = vector.load %arg3[%c0_3, %c0_4] : memref<32x1xf32, #tpu.memory_space<vmem>>, vector<32x1xf32>
    %4 = vector.broadcast %3 : vector<32x1xf32> to vector<32x128xf32>
    %5 = arith.addf %2, %4 : vector<32x128xf32>
    %cst_5 = arith.constant 0.000000e+00 : f32
    %6 = vector.broadcast %cst_5 : f32 to vector<32x128xf32>
    %7 = arith.cmpf oge, %5, %6 : vector<32x128xf32>
    %cst_6 = arith.constant 2.000000e-01 : f32
    %8 = vector.broadcast %cst_6 : f32 to vector<32x128xf32>
    %9 = arith.mulf %8, %5 : vector<32x128xf32>
    %10 = arith.select %7, %5, %9 : vector<32x128xi1>, vector<32x128xf32>
    %11 = arith.truncf %10 : vector<32x128xf32> to vector<32x128xbf16>
    %c0_7 = arith.constant 0 : index
    %c0_8 = arith.constant 0 : index
    %12 = vector.load %arg4[%c0_7, %c0_8] : memref<32x128xbf16, #tpu.memory_space<vmem>>, vector<32x128xbf16>
    tpu.vector_store %arg4[%c0_7, %c0_8], %11 {strides = array<i32>} : memref<32x128xbf16, #tpu.memory_space<vmem>>, vector<32x128xbf16>,
    return
  }
  func.func @transform_0(%arg0: i32) -> (i32, i32) {
    %c0_i32 = arith.constant 0 : i32
    %c0_i32_0 = arith.constant 0 : i32
    %c0_i32_1 = arith.constant 0 : i32
    return %c0_i32, %c0_i32_0 : i32, i32
  }
  func.func @transform_1(%arg0: i32) -> (i32, i32) {
    %c0_i32 = arith.constant 0 : i32
    %c0_i32_0 = arith.constant 0 : i32
    return %c0_i32, %arg0 : i32, i32
  }
  func.func @transform_2(%arg0: i32) -> (i32, i32) {
    %c0_i32 = arith.constant 0 : i32
    %c0_i32_0 = arith.constant 0 : i32
    %c0_i32_1 = arith.constant 0 : i32
    return %c0_i32, %c0_i32_0 : i32, i32
  }
  func.func @transform_3(%arg0: i32) -> (i32, i32) {
    %c0_i32 = arith.constant 0 : i32
    %c0_i32_0 = arith.constant 0 : i32
    return %c0_i32, %arg0 : i32, i32
  }
}

module attributes {stable_mosaic.version = 11 : i64} {
  func.func @_heads_kernel(%arg0: i32, %arg1: memref<32x128xbf16, #tpu.memory_space<vmem>>, %arg2: memref<128x2xbf16, #tpu.memory_space<vmem>>, %arg3: memref<1x32xbf16, #tpu.memory_space<vmem>>, %arg4: memref<1x1xf32, #tpu.memory_space<vmem>>, %arg5: memref<2x32xf32, #tpu.memory_space<vmem>>, %arg6: memref<2x1xf32, #tpu.memory_space<vmem>>, %arg7: memref<2x2xf32, #tpu.memory_space<vmem>>, %arg8: memref<1x128xf32, #tpu.memory_space<vmem>>, %arg9: memref<32x2xf32, #tpu.memory_space<vmem>>, %arg10: memref<32x2xf32, #tpu.memory_space<vmem>>) attributes {dimension_semantics = [#tpu.dimension_semantics<arbitrary>], iteration_bounds = array<i64: 1>, scalar_prefetch = 0 : i64, scratch_operands = 1 : i64, tpu.core_type = #tpu.core_type<tc>, window_params = [{transform_indices = @transform_0, window_bounds = array<i64: 32, 128>}, {transform_indices = @transform_1, window_bounds = array<i64: 128, 2>}, {pipeline_mode = #tpu.pipeline_mode<synchronous>, transform_indices = @transform_2, window_bounds = array<i64: 1, 32>}, {pipeline_mode = #tpu.pipeline_mode<synchronous>, transform_indices = @transform_3, window_bounds = array<i64: 1, 1>}, {pipeline_mode = #tpu.pipeline_mode<synchronous>, transform_indices = @transform_4, window_bounds = array<i64: 2, 32>}, {pipeline_mode = #tpu.pipeline_mode<synchronous>, transform_indices = @transform_5, window_bounds = array<i64: 2, 1>}, {pipeline_mode = #tpu.pipeline_mode<synchronous>, transform_indices = @transform_6, window_bounds = array<i64: 2, 2>}, {transform_indices = @transform_7, window_bounds = array<i64: 1, 128>}, {pipeline_mode = #tpu.pipeline_mode<synchronous>, transform_indices = @transform_8, window_bounds = array<i64: 32, 2>}]} {
    %c0_i32 = arith.constant 0 : i32
    %0 = arith.cmpi eq, %arg0, %c0_i32 : i32
    %1 = arith.extui %0 : i1 to i32
    %c0_i32_0 = arith.constant 0 : i32
    %2 = arith.cmpi ne, %1, %c0_i32_0 : i32
    scf.if %2 {
      %cst_17 = arith.constant 0.000000e+00 : f32
      %18 = vector.broadcast %cst_17 : f32 to vector<32x2xf32>
      %c0_18 = arith.constant 0 : index
      %c0_19 = arith.constant 0 : index
      %19 = vector.load %arg10[%c0_18, %c0_19] : memref<32x2xf32, #tpu.memory_space<vmem>>, vector<32x2xf32>
      tpu.vector_store %arg10[%c0_18, %c0_19], %18 {strides = array<i32>} : memref<32x2xf32, #tpu.memory_space<vmem>>, vector<32x2xf32>,
    } else {
    }
    %c0 = arith.constant 0 : index
    %c0_1 = arith.constant 0 : index
    %3 = vector.load %arg1[%c0, %c0_1] : memref<32x128xbf16, #tpu.memory_space<vmem>>, vector<32x128xbf16>
    %c0_2 = arith.constant 0 : index
    %c0_3 = arith.constant 0 : index
    %4 = vector.load %arg3[%c0_2, %c0_3] : memref<1x32xbf16, #tpu.memory_space<vmem>>, vector<1x32xbf16>
    %cst = arith.constant dense<0.000000e+00> : vector<1x128xf32>
    %5 = tpu.matmul %4, %3, %cst {dimension_numbers = #tpu.dot_dimension_numbers<[1], [0], [0], [1], [0, 0, 1, 1], [], []>} : vector<1x32xbf16>, vector<32x128xbf16>, vector<1x128xf32> -> vector<1x128xf32>
    %c0_4 = arith.constant 0 : index
    %c0_5 = arith.constant 0 : index
    %6 = vector.load %arg4[%c0_4, %c0_5] : memref<1x1xf32, #tpu.memory_space<vmem>>, vector<1x1xf32>
    %7 = vector.broadcast %6 : vector<1x1xf32> to vector<1x128xf32>
    %8 = arith.addf %5, %7 : vector<1x128xf32>
    %c0_6 = arith.constant 0 : index
    %c0_7 = arith.constant 0 : index
    %9 = vector.load %arg8[%c0_6, %c0_7] : memref<1x128xf32, #tpu.memory_space<vmem>>, vector<1x128xf32>
    tpu.vector_store %arg8[%c0_6, %c0_7], %8 {strides = array<i32>} : memref<1x128xf32, #tpu.memory_space<vmem>>, vector<1x128xf32>,
    %c0_8 = arith.constant 0 : index
    %c0_9 = arith.constant 0 : index
    %10 = vector.load %arg10[%c0_8, %c0_9] : memref<32x2xf32, #tpu.memory_space<vmem>>, vector<32x2xf32>
    %c0_10 = arith.constant 0 : index
    %c0_11 = arith.constant 0 : index
    %11 = vector.load %arg2[%c0_10, %c0_11] : memref<128x2xbf16, #tpu.memory_space<vmem>>, vector<128x2xbf16>
    %cst_12 = arith.constant dense<0.000000e+00> : vector<32x2xf32>
    %12 = tpu.matmul %3, %11, %cst_12 {dimension_numbers = #tpu.dot_dimension_numbers<[1], [0], [0], [1], [0, 0, 1, 1], [], []>} : vector<32x128xbf16>, vector<128x2xbf16>, vector<32x2xf32> -> vector<32x2xf32>
    %13 = arith.addf %10, %12 : vector<32x2xf32>
    %c0_13 = arith.constant 0 : index
    %c0_14 = arith.constant 0 : index
    %14 = vector.load %arg10[%c0_13, %c0_14] : memref<32x2xf32, #tpu.memory_space<vmem>>, vector<32x2xf32>
    tpu.vector_store %arg10[%c0_13, %c0_14], %13 {strides = array<i32>} : memref<32x2xf32, #tpu.memory_space<vmem>>, vector<32x2xf32>,
    %c0_i32_15 = arith.constant 0 : i32
    %15 = arith.cmpi eq, %arg0, %c0_i32_15 : i32
    %16 = arith.extui %15 : i1 to i32
    %c0_i32_16 = arith.constant 0 : i32
    %17 = arith.cmpi ne, %16, %c0_i32_16 : i32
    scf.if %17 {
      %c0_17 = arith.constant 0 : index
      %c0_18 = arith.constant 0 : index
      %18 = vector.load %arg10[%c0_17, %c0_18] : memref<32x2xf32, #tpu.memory_space<vmem>>, vector<32x2xf32>
      %cst_19 = arith.constant 2.500000e-01 : f32
      %19 = vector.broadcast %cst_19 : f32 to vector<32x2xf32>
      %20 = arith.mulf %18, %19 : vector<32x2xf32>
      %c0_20 = arith.constant 0 : index
      %c0_21 = arith.constant 0 : index
      %21 = vector.load %arg9[%c0_20, %c0_21] : memref<32x2xf32, #tpu.memory_space<vmem>>, vector<32x2xf32>
      tpu.vector_store %arg9[%c0_20, %c0_21], %20 {strides = array<i32>} : memref<32x2xf32, #tpu.memory_space<vmem>>, vector<32x2xf32>,
      %c0_22 = arith.constant 0 : index
      %c0_23 = arith.constant 0 : index
      %22 = vector.load %arg5[%c0_22, %c0_23] : memref<2x32xf32, #tpu.memory_space<vmem>>, vector<2x32xf32>
      %cst_24 = arith.constant dense<0.000000e+00> : vector<2x2xf32>
      %23 = tpu.matmul %22, %20, %cst_24 {dimension_numbers = #tpu.dot_dimension_numbers<[1], [0], [0], [1], [0, 0, 1, 1], [], []>} : vector<2x32xf32>, vector<32x2xf32>, vector<2x2xf32> -> vector<2x2xf32>
      %c0_25 = arith.constant 0 : index
      %c0_26 = arith.constant 0 : index
      %24 = vector.load %arg6[%c0_25, %c0_26] : memref<2x1xf32, #tpu.memory_space<vmem>>, vector<2x1xf32>
      %25 = vector.broadcast %24 : vector<2x1xf32> to vector<2x2xf32>
      %26 = arith.addf %23, %25 : vector<2x2xf32>
      %c0_27 = arith.constant 0 : index
      %c0_28 = arith.constant 0 : index
      %27 = vector.load %arg7[%c0_27, %c0_28] : memref<2x2xf32, #tpu.memory_space<vmem>>, vector<2x2xf32>
      tpu.vector_store %arg7[%c0_27, %c0_28], %26 {strides = array<i32>} : memref<2x2xf32, #tpu.memory_space<vmem>>, vector<2x2xf32>,
    } else {
    }
    return
  }
  func.func @transform_0(%arg0: i32) -> (i32, i32) {
    %c0_i32 = arith.constant 0 : i32
    %c0_i32_0 = arith.constant 0 : i32
    return %c0_i32, %arg0 : i32, i32
  }
  func.func @transform_1(%arg0: i32) -> (i32, i32) {
    %c0_i32 = arith.constant 0 : i32
    %c0_i32_0 = arith.constant 0 : i32
    return %arg0, %c0_i32 : i32, i32
  }
  func.func @transform_2(%arg0: i32) -> (i32, i32) {
    %c0_i32 = arith.constant 0 : i32
    %c0_i32_0 = arith.constant 0 : i32
    %c0_i32_1 = arith.constant 0 : i32
    return %c0_i32, %c0_i32_0 : i32, i32
  }
  func.func @transform_3(%arg0: i32) -> (i32, i32) {
    %c0_i32 = arith.constant 0 : i32
    %c0_i32_0 = arith.constant 0 : i32
    %c0_i32_1 = arith.constant 0 : i32
    return %c0_i32, %c0_i32_0 : i32, i32
  }
  func.func @transform_4(%arg0: i32) -> (i32, i32) {
    %c0_i32 = arith.constant 0 : i32
    %c0_i32_0 = arith.constant 0 : i32
    %c0_i32_1 = arith.constant 0 : i32
    return %c0_i32, %c0_i32_0 : i32, i32
  }
  func.func @transform_5(%arg0: i32) -> (i32, i32) {
    %c0_i32 = arith.constant 0 : i32
    %c0_i32_0 = arith.constant 0 : i32
    %c0_i32_1 = arith.constant 0 : i32
    return %c0_i32, %c0_i32_0 : i32, i32
  }
  func.func @transform_6(%arg0: i32) -> (i32, i32) {
    %c0_i32 = arith.constant 0 : i32
    %c0_i32_0 = arith.constant 0 : i32
    %c0_i32_1 = arith.constant 0 : i32
    return %c0_i32, %c0_i32_0 : i32, i32
  }
  func.func @transform_7(%arg0: i32) -> (i32, i32) {
    %c0_i32 = arith.constant 0 : i32
    %c0_i32_0 = arith.constant 0 : i32
    return %c0_i32, %arg0 : i32, i32
  }
  func.func @transform_8(%arg0: i32) -> (i32, i32) {
    %c0_i32 = arith.constant 0 : i32
    %c0_i32_0 = arith.constant 0 : i32
    %c0_i32_1 = arith.constant 0 : i32
    return %c0_i32, %c0_i32_0 : i32, i32
  }
}

module attributes {stable_mosaic.version = 11 : i64} {
  func.func @_gemm_kernel_single(%arg0: i32, %arg1: memref<8x48xbf16, #tpu.memory_space<vmem>>, %arg2: memref<48x256xbf16, #tpu.memory_space<vmem>>, %arg3: memref<8x1xf32, #tpu.memory_space<vmem>>, %arg4: memref<8x256xbf16, #tpu.memory_space<vmem>>) attributes {dimension_semantics = [#tpu.dimension_semantics<parallel>], iteration_bounds = array<i64: 2>, scalar_prefetch = 0 : i64, scratch_operands = 0 : i64, tpu.core_type = #tpu.core_type<tc>, window_params = [{pipeline_mode = #tpu.pipeline_mode<synchronous>, transform_indices = @transform_0, window_bounds = array<i64: 8, 48>}, {transform_indices = @transform_1, window_bounds = array<i64: 48, 256>}, {pipeline_mode = #tpu.pipeline_mode<synchronous>, transform_indices = @transform_2, window_bounds = array<i64: 8, 1>}, {transform_indices = @transform_3, window_bounds = array<i64: 8, 256>}]} {
    %c0 = arith.constant 0 : index
    %c0_0 = arith.constant 0 : index
    %0 = vector.load %arg1[%c0, %c0_0] : memref<8x48xbf16, #tpu.memory_space<vmem>>, vector<8x48xbf16>
    %c0_1 = arith.constant 0 : index
    %c0_2 = arith.constant 0 : index
    %1 = vector.load %arg2[%c0_1, %c0_2] : memref<48x256xbf16, #tpu.memory_space<vmem>>, vector<48x256xbf16>
    %cst = arith.constant dense<0.000000e+00> : vector<8x256xf32>
    %2 = tpu.matmul %0, %1, %cst {dimension_numbers = #tpu.dot_dimension_numbers<[1], [0], [0], [1], [0, 0, 1, 1], [], []>} : vector<8x48xbf16>, vector<48x256xbf16>, vector<8x256xf32> -> vector<8x256xf32>
    %c0_3 = arith.constant 0 : index
    %c0_4 = arith.constant 0 : index
    %3 = vector.load %arg3[%c0_3, %c0_4] : memref<8x1xf32, #tpu.memory_space<vmem>>, vector<8x1xf32>
    %4 = vector.broadcast %3 : vector<8x1xf32> to vector<8x256xf32>
    %5 = arith.addf %2, %4 : vector<8x256xf32>
    %cst_5 = arith.constant 0.000000e+00 : f32
    %6 = vector.broadcast %cst_5 : f32 to vector<8x256xf32>
    %7 = arith.cmpf oge, %5, %6 : vector<8x256xf32>
    %cst_6 = arith.constant 2.000000e-01 : f32
    %8 = vector.broadcast %cst_6 : f32 to vector<8x256xf32>
    %9 = arith.mulf %8, %5 : vector<8x256xf32>
    %10 = arith.select %7, %5, %9 : vector<8x256xi1>, vector<8x256xf32>
    %11 = arith.truncf %10 : vector<8x256xf32> to vector<8x256xbf16>
    %c0_7 = arith.constant 0 : index
    %c0_8 = arith.constant 0 : index
    %12 = vector.load %arg4[%c0_7, %c0_8] : memref<8x256xbf16, #tpu.memory_space<vmem>>, vector<8x256xbf16>
    tpu.vector_store %arg4[%c0_7, %c0_8], %11 {strides = array<i32>} : memref<8x256xbf16, #tpu.memory_space<vmem>>, vector<8x256xbf16>,
    return
  }
  func.func @transform_0(%arg0: i32) -> (i32, i32) {
    %c0_i32 = arith.constant 0 : i32
    %c0_i32_0 = arith.constant 0 : i32
    %c0_i32_1 = arith.constant 0 : i32
    return %c0_i32, %c0_i32_0 : i32, i32
  }
  func.func @transform_1(%arg0: i32) -> (i32, i32) {
    %c0_i32 = arith.constant 0 : i32
    %c0_i32_0 = arith.constant 0 : i32
    return %c0_i32, %arg0 : i32, i32
  }
  func.func @transform_2(%arg0: i32) -> (i32, i32) {
    %c0_i32 = arith.constant 0 : i32
    %c0_i32_0 = arith.constant 0 : i32
    %c0_i32_1 = arith.constant 0 : i32
    return %c0_i32, %c0_i32_0 : i32, i32
  }
  func.func @transform_3(%arg0: i32) -> (i32, i32) {
    %c0_i32 = arith.constant 0 : i32
    %c0_i32_0 = arith.constant 0 : i32
    return %c0_i32, %arg0 : i32, i32
  }
}

module attributes {stable_mosaic.version = 11 : i64} {
  func.func @_gemm_kernel_single(%arg0: i32, %arg1: memref<16x128xbf16, #tpu.memory_space<vmem>>, %arg2: memref<128x128xbf16, #tpu.memory_space<vmem>>, %arg3: memref<16x1xf32, #tpu.memory_space<vmem>>, %arg4: memref<16x128xbf16, #tpu.memory_space<vmem>>) attributes {dimension_semantics = [#tpu.dimension_semantics<parallel>], iteration_bounds = array<i64: 1>, scalar_prefetch = 0 : i64, scratch_operands = 0 : i64, tpu.core_type = #tpu.core_type<tc>, window_params = [{pipeline_mode = #tpu.pipeline_mode<synchronous>, transform_indices = @transform_0, window_bounds = array<i64: 16, 128>}, {transform_indices = @transform_1, window_bounds = array<i64: 128, 128>}, {pipeline_mode = #tpu.pipeline_mode<synchronous>, transform_indices = @transform_2, window_bounds = array<i64: 16, 1>}, {transform_indices = @transform_3, window_bounds = array<i64: 16, 128>}]} {
    %c0 = arith.constant 0 : index
    %c0_0 = arith.constant 0 : index
    %0 = vector.load %arg1[%c0, %c0_0] : memref<16x128xbf16, #tpu.memory_space<vmem>>, vector<16x128xbf16>
    %c0_1 = arith.constant 0 : index
    %c0_2 = arith.constant 0 : index
    %1 = vector.load %arg2[%c0_1, %c0_2] : memref<128x128xbf16, #tpu.memory_space<vmem>>, vector<128x128xbf16>
    %cst = arith.constant dense<0.000000e+00> : vector<16x128xf32>
    %2 = tpu.matmul %0, %1, %cst {dimension_numbers = #tpu.dot_dimension_numbers<[1], [0], [0], [1], [0, 0, 1, 1], [], []>} : vector<16x128xbf16>, vector<128x128xbf16>, vector<16x128xf32> -> vector<16x128xf32>
    %c0_3 = arith.constant 0 : index
    %c0_4 = arith.constant 0 : index
    %3 = vector.load %arg3[%c0_3, %c0_4] : memref<16x1xf32, #tpu.memory_space<vmem>>, vector<16x1xf32>
    %4 = vector.broadcast %3 : vector<16x1xf32> to vector<16x128xf32>
    %5 = arith.addf %2, %4 : vector<16x128xf32>
    %cst_5 = arith.constant 0.000000e+00 : f32
    %6 = vector.broadcast %cst_5 : f32 to vector<16x128xf32>
    %7 = arith.cmpf oge, %5, %6 : vector<16x128xf32>
    %cst_6 = arith.constant 2.000000e-01 : f32
    %8 = vector.broadcast %cst_6 : f32 to vector<16x128xf32>
    %9 = arith.mulf %8, %5 : vector<16x128xf32>
    %10 = arith.select %7, %5, %9 : vector<16x128xi1>, vector<16x128xf32>
    %11 = arith.truncf %10 : vector<16x128xf32> to vector<16x128xbf16>
    %c0_7 = arith.constant 0 : index
    %c0_8 = arith.constant 0 : index
    %12 = vector.load %arg4[%c0_7, %c0_8] : memref<16x128xbf16, #tpu.memory_space<vmem>>, vector<16x128xbf16>
    tpu.vector_store %arg4[%c0_7, %c0_8], %11 {strides = array<i32>} : memref<16x128xbf16, #tpu.memory_space<vmem>>, vector<16x128xbf16>,
    return
  }
  func.func @transform_0(%arg0: i32) -> (i32, i32) {
    %c0_i32 = arith.constant 0 : i32
    %c0_i32_0 = arith.constant 0 : i32
    %c0_i32_1 = arith.constant 0 : i32
    return %c0_i32, %c0_i32_0 : i32, i32
  }
  func.func @transform_1(%arg0: i32) -> (i32, i32) {
    %c0_i32 = arith.constant 0 : i32
    %c0_i32_0 = arith.constant 0 : i32
    return %c0_i32, %arg0 : i32, i32
  }
  func.func @transform_2(%arg0: i32) -> (i32, i32) {
    %c0_i32 = arith.constant 0 : i32
    %c0_i32_0 = arith.constant 0 : i32
    %c0_i32_1 = arith.constant 0 : i32
    return %c0_i32, %c0_i32_0 : i32, i32
  }
  func.func @transform_3(%arg0: i32) -> (i32, i32) {
    %c0_i32 = arith.constant 0 : i32
    %c0_i32_0 = arith.constant 0 : i32
    return %c0_i32, %arg0 : i32, i32
  }
}

module attributes {stable_mosaic.version = 11 : i64} {
  func.func @_gemm_kernel_single(%arg0: i32, %arg1: memref<32x256xbf16, #tpu.memory_space<vmem>>, %arg2: memref<256x128xbf16, #tpu.memory_space<vmem>>, %arg3: memref<32x1xf32, #tpu.memory_space<vmem>>, %arg4: memref<32x128xbf16, #tpu.memory_space<vmem>>) attributes {dimension_semantics = [#tpu.dimension_semantics<parallel>], iteration_bounds = array<i64: 1>, scalar_prefetch = 0 : i64, scratch_operands = 0 : i64, tpu.core_type = #tpu.core_type<tc>, window_params = [{pipeline_mode = #tpu.pipeline_mode<synchronous>, transform_indices = @transform_0, window_bounds = array<i64: 32, 256>}, {transform_indices = @transform_1, window_bounds = array<i64: 256, 128>}, {pipeline_mode = #tpu.pipeline_mode<synchronous>, transform_indices = @transform_2, window_bounds = array<i64: 32, 1>}, {transform_indices = @transform_3, window_bounds = array<i64: 32, 128>}]} {
    %c0 = arith.constant 0 : index
    %c0_0 = arith.constant 0 : index
    %0 = vector.load %arg1[%c0, %c0_0] : memref<32x256xbf16, #tpu.memory_space<vmem>>, vector<32x256xbf16>
    %c0_1 = arith.constant 0 : index
    %c0_2 = arith.constant 0 : index
    %1 = vector.load %arg2[%c0_1, %c0_2] : memref<256x128xbf16, #tpu.memory_space<vmem>>, vector<256x128xbf16>
    %cst = arith.constant dense<0.000000e+00> : vector<32x128xf32>
    %2 = tpu.matmul %0, %1, %cst {dimension_numbers = #tpu.dot_dimension_numbers<[1], [0], [0], [1], [0, 0, 1, 1], [], []>} : vector<32x256xbf16>, vector<256x128xbf16>, vector<32x128xf32> -> vector<32x128xf32>
    %c0_3 = arith.constant 0 : index
    %c0_4 = arith.constant 0 : index
    %3 = vector.load %arg3[%c0_3, %c0_4] : memref<32x1xf32, #tpu.memory_space<vmem>>, vector<32x1xf32>
    %4 = vector.broadcast %3 : vector<32x1xf32> to vector<32x128xf32>
    %5 = arith.addf %2, %4 : vector<32x128xf32>
    %cst_5 = arith.constant 0.000000e+00 : f32
    %6 = vector.broadcast %cst_5 : f32 to vector<32x128xf32>
    %7 = arith.cmpf oge, %5, %6 : vector<32x128xf32>
    %cst_6 = arith.constant 2.000000e-01 : f32
    %8 = vector.broadcast %cst_6 : f32 to vector<32x128xf32>
    %9 = arith.mulf %8, %5 : vector<32x128xf32>
    %10 = arith.select %7, %5, %9 : vector<32x128xi1>, vector<32x128xf32>
    %11 = arith.truncf %10 : vector<32x128xf32> to vector<32x128xbf16>
    %c0_7 = arith.constant 0 : index
    %c0_8 = arith.constant 0 : index
    %12 = vector.load %arg4[%c0_7, %c0_8] : memref<32x128xbf16, #tpu.memory_space<vmem>>, vector<32x128xbf16>
    tpu.vector_store %arg4[%c0_7, %c0_8], %11 {strides = array<i32>} : memref<32x128xbf16, #tpu.memory_space<vmem>>, vector<32x128xbf16>,
    return
  }
  func.func @transform_0(%arg0: i32) -> (i32, i32) {
    %c0_i32 = arith.constant 0 : i32
    %c0_i32_0 = arith.constant 0 : i32
    %c0_i32_1 = arith.constant 0 : i32
    return %c0_i32, %c0_i32_0 : i32, i32
  }
  func.func @transform_1(%arg0: i32) -> (i32, i32) {
    %c0_i32 = arith.constant 0 : i32
    %c0_i32_0 = arith.constant 0 : i32
    return %c0_i32, %arg0 : i32, i32
  }
  func.func @transform_2(%arg0: i32) -> (i32, i32) {
    %c0_i32 = arith.constant 0 : i32
    %c0_i32_0 = arith.constant 0 : i32
    %c0_i32_1 = arith.constant 0 : i32
    return %c0_i32, %c0_i32_0 : i32, i32
  }
  func.func @transform_3(%arg0: i32) -> (i32, i32) {
    %c0_i32 = arith.constant 0 : i32
    %c0_i32_0 = arith.constant 0 : i32
    return %c0_i32, %arg0 : i32, i32
  }
}

module attributes {stable_mosaic.version = 11 : i64} {
  func.func @_heads_kernel(%arg0: i32, %arg1: memref<32x128xbf16, #tpu.memory_space<vmem>>, %arg2: memref<128x2xbf16, #tpu.memory_space<vmem>>, %arg3: memref<1x32xbf16, #tpu.memory_space<vmem>>, %arg4: memref<1x1xf32, #tpu.memory_space<vmem>>, %arg5: memref<2x32xf32, #tpu.memory_space<vmem>>, %arg6: memref<2x1xf32, #tpu.memory_space<vmem>>, %arg7: memref<2x2xf32, #tpu.memory_space<vmem>>, %arg8: memref<1x128xf32, #tpu.memory_space<vmem>>, %arg9: memref<32x2xf32, #tpu.memory_space<vmem>>, %arg10: memref<32x2xf32, #tpu.memory_space<vmem>>) attributes {dimension_semantics = [#tpu.dimension_semantics<arbitrary>], iteration_bounds = array<i64: 1>, scalar_prefetch = 0 : i64, scratch_operands = 1 : i64, tpu.core_type = #tpu.core_type<tc>, window_params = [{transform_indices = @transform_0, window_bounds = array<i64: 32, 128>}, {transform_indices = @transform_1, window_bounds = array<i64: 128, 2>}, {pipeline_mode = #tpu.pipeline_mode<synchronous>, transform_indices = @transform_2, window_bounds = array<i64: 1, 32>}, {pipeline_mode = #tpu.pipeline_mode<synchronous>, transform_indices = @transform_3, window_bounds = array<i64: 1, 1>}, {pipeline_mode = #tpu.pipeline_mode<synchronous>, transform_indices = @transform_4, window_bounds = array<i64: 2, 32>}, {pipeline_mode = #tpu.pipeline_mode<synchronous>, transform_indices = @transform_5, window_bounds = array<i64: 2, 1>}, {pipeline_mode = #tpu.pipeline_mode<synchronous>, transform_indices = @transform_6, window_bounds = array<i64: 2, 2>}, {transform_indices = @transform_7, window_bounds = array<i64: 1, 128>}, {pipeline_mode = #tpu.pipeline_mode<synchronous>, transform_indices = @transform_8, window_bounds = array<i64: 32, 2>}]} {
    %c0_i32 = arith.constant 0 : i32
    %0 = arith.cmpi eq, %arg0, %c0_i32 : i32
    %1 = arith.extui %0 : i1 to i32
    %c0_i32_0 = arith.constant 0 : i32
    %2 = arith.cmpi ne, %1, %c0_i32_0 : i32
    scf.if %2 {
      %cst_17 = arith.constant 0.000000e+00 : f32
      %18 = vector.broadcast %cst_17 : f32 to vector<32x2xf32>
      %c0_18 = arith.constant 0 : index
      %c0_19 = arith.constant 0 : index
      %19 = vector.load %arg10[%c0_18, %c0_19] : memref<32x2xf32, #tpu.memory_space<vmem>>, vector<32x2xf32>
      tpu.vector_store %arg10[%c0_18, %c0_19], %18 {strides = array<i32>} : memref<32x2xf32, #tpu.memory_space<vmem>>, vector<32x2xf32>,
    } else {
    }
    %c0 = arith.constant 0 : index
    %c0_1 = arith.constant 0 : index
    %3 = vector.load %arg1[%c0, %c0_1] : memref<32x128xbf16, #tpu.memory_space<vmem>>, vector<32x128xbf16>
    %c0_2 = arith.constant 0 : index
    %c0_3 = arith.constant 0 : index
    %4 = vector.load %arg3[%c0_2, %c0_3] : memref<1x32xbf16, #tpu.memory_space<vmem>>, vector<1x32xbf16>
    %cst = arith.constant dense<0.000000e+00> : vector<1x128xf32>
    %5 = tpu.matmul %4, %3, %cst {dimension_numbers = #tpu.dot_dimension_numbers<[1], [0], [0], [1], [0, 0, 1, 1], [], []>} : vector<1x32xbf16>, vector<32x128xbf16>, vector<1x128xf32> -> vector<1x128xf32>
    %c0_4 = arith.constant 0 : index
    %c0_5 = arith.constant 0 : index
    %6 = vector.load %arg4[%c0_4, %c0_5] : memref<1x1xf32, #tpu.memory_space<vmem>>, vector<1x1xf32>
    %7 = vector.broadcast %6 : vector<1x1xf32> to vector<1x128xf32>
    %8 = arith.addf %5, %7 : vector<1x128xf32>
    %c0_6 = arith.constant 0 : index
    %c0_7 = arith.constant 0 : index
    %9 = vector.load %arg8[%c0_6, %c0_7] : memref<1x128xf32, #tpu.memory_space<vmem>>, vector<1x128xf32>
    tpu.vector_store %arg8[%c0_6, %c0_7], %8 {strides = array<i32>} : memref<1x128xf32, #tpu.memory_space<vmem>>, vector<1x128xf32>,
    %c0_8 = arith.constant 0 : index
    %c0_9 = arith.constant 0 : index
    %10 = vector.load %arg10[%c0_8, %c0_9] : memref<32x2xf32, #tpu.memory_space<vmem>>, vector<32x2xf32>
    %c0_10 = arith.constant 0 : index
    %c0_11 = arith.constant 0 : index
    %11 = vector.load %arg2[%c0_10, %c0_11] : memref<128x2xbf16, #tpu.memory_space<vmem>>, vector<128x2xbf16>
    %cst_12 = arith.constant dense<0.000000e+00> : vector<32x2xf32>
    %12 = tpu.matmul %3, %11, %cst_12 {dimension_numbers = #tpu.dot_dimension_numbers<[1], [0], [0], [1], [0, 0, 1, 1], [], []>} : vector<32x128xbf16>, vector<128x2xbf16>, vector<32x2xf32> -> vector<32x2xf32>
    %13 = arith.addf %10, %12 : vector<32x2xf32>
    %c0_13 = arith.constant 0 : index
    %c0_14 = arith.constant 0 : index
    %14 = vector.load %arg10[%c0_13, %c0_14] : memref<32x2xf32, #tpu.memory_space<vmem>>, vector<32x2xf32>
    tpu.vector_store %arg10[%c0_13, %c0_14], %13 {strides = array<i32>} : memref<32x2xf32, #tpu.memory_space<vmem>>, vector<32x2xf32>,
    %c0_i32_15 = arith.constant 0 : i32
    %15 = arith.cmpi eq, %arg0, %c0_i32_15 : i32
    %16 = arith.extui %15 : i1 to i32
    %c0_i32_16 = arith.constant 0 : i32
    %17 = arith.cmpi ne, %16, %c0_i32_16 : i32
    scf.if %17 {
      %c0_17 = arith.constant 0 : index
      %c0_18 = arith.constant 0 : index
      %18 = vector.load %arg10[%c0_17, %c0_18] : memref<32x2xf32, #tpu.memory_space<vmem>>, vector<32x2xf32>
      %cst_19 = arith.constant 6.250000e-02 : f32
      %19 = vector.broadcast %cst_19 : f32 to vector<32x2xf32>
      %20 = arith.mulf %18, %19 : vector<32x2xf32>
      %c0_20 = arith.constant 0 : index
      %c0_21 = arith.constant 0 : index
      %21 = vector.load %arg9[%c0_20, %c0_21] : memref<32x2xf32, #tpu.memory_space<vmem>>, vector<32x2xf32>
      tpu.vector_store %arg9[%c0_20, %c0_21], %20 {strides = array<i32>} : memref<32x2xf32, #tpu.memory_space<vmem>>, vector<32x2xf32>,
      %c0_22 = arith.constant 0 : index
      %c0_23 = arith.constant 0 : index
      %22 = vector.load %arg5[%c0_22, %c0_23] : memref<2x32xf32, #tpu.memory_space<vmem>>, vector<2x32xf32>
      %cst_24 = arith.constant dense<0.000000e+00> : vector<2x2xf32>
      %23 = tpu.matmul %22, %20, %cst_24 {dimension_numbers = #tpu.dot_dimension_numbers<[1], [0], [0], [1], [0, 0, 1, 1], [], []>} : vector<2x32xf32>, vector<32x2xf32>, vector<2x2xf32> -> vector<2x2xf32>
      %c0_25 = arith.constant 0 : index
      %c0_26 = arith.constant 0 : index
      %24 = vector.load %arg6[%c0_25, %c0_26] : memref<2x1xf32, #tpu.memory_space<vmem>>, vector<2x1xf32>
      %25 = vector.broadcast %24 : vector<2x1xf32> to vector<2x2xf32>
      %26 = arith.addf %23, %25 : vector<2x2xf32>
      %c0_27 = arith.constant 0 : index
      %c0_28 = arith.constant 0 : index
      %27 = vector.load %arg7[%c0_27, %c0_28] : memref<2x2xf32, #tpu.memory_space<vmem>>, vector<2x2xf32>
      tpu.vector_store %arg7[%c0_27, %c0_28], %26 {strides = array<i32>} : memref<2x2xf32, #tpu.memory_space<vmem>>, vector<2x2xf32>,
    } else {
    }
    return
  }
  func.func @transform_0(%arg0: i32) -> (i32, i32) {
    %c0_i32 = arith.constant 0 : i32
    %c0_i32_0 = arith.constant 0 : i32
    return %c0_i32, %arg0 : i32, i32
  }
  func.func @transform_1(%arg0: i32) -> (i32, i32) {
    %c0_i32 = arith.constant 0 : i32
    %c0_i32_0 = arith.constant 0 : i32
    return %arg0, %c0_i32 : i32, i32
  }
  func.func @transform_2(%arg0: i32) -> (i32, i32) {
    %c0_i32 = arith.constant 0 : i32
    %c0_i32_0 = arith.constant 0 : i32
    %c0_i32_1 = arith.constant 0 : i32
    return %c0_i32, %c0_i32_0 : i32, i32
  }
  func.func @transform_3(%arg0: i32) -> (i32, i32) {
    %c0_i32 = arith.constant 0 : i32
    %c0_i32_0 = arith.constant 0 : i32
    %c0_i32_1 = arith.constant 0 : i32
    return %c0_i32, %c0_i32_0 : i32, i32
  }
  func.func @transform_4(%arg0: i32) -> (i32, i32) {
    %c0_i32 = arith.constant 0 : i32
    %c0_i32_0 = arith.constant 0 : i32
    %c0_i32_1 = arith.constant 0 : i32
    return %c0_i32, %c0_i32_0 : i32, i32
  }
  func.func @transform_5(%arg0: i32) -> (i32, i32) {
    %c0_i32 = arith.constant 0 : i32
    %c0_i32_0 = arith.constant 0 : i32
    %c0_i32_1 = arith.constant 0 : i32
    return %c0_i32, %c0_i32_0 : i32, i32
  }
  func.func @transform_6(%arg0: i32) -> (i32, i32) {
    %c0_i32 = arith.constant 0 : i32
    %c0_i32_0 = arith.constant 0 : i32
    %c0_i32_1 = arith.constant 0 : i32
    return %c0_i32, %c0_i32_0 : i32, i32
  }
  func.func @transform_7(%arg0: i32) -> (i32, i32) {
    %c0_i32 = arith.constant 0 : i32
    %c0_i32_0 = arith.constant 0 : i32
    return %c0_i32, %arg0 : i32, i32
  }
  func.func @transform_8(%arg0: i32) -> (i32, i32) {
    %c0_i32 = arith.constant 0 : i32
    %c0_i32_0 = arith.constant 0 : i32
    %c0_i32_1 = arith.constant 0 : i32
    return %c0_i32, %c0_i32_0 : i32, i32
  }
}

</mosaic_0001>

<bundles_post_ra>
// kernel: discriminator_forward.9
= control target key start
LH: loop header
LB: loop body
LE: loop exit
PB: predicated region body
PF: predicated region fallthrough
CT: control target
= control target key end

     0   :  { %s418_s15 = smov 127   ;;  %vm352_vm0 = vcmask 130048   ;;  %s860_s0 = inlined_call_operand.vmem [shape: f32[4,6,17,17], index: 0, kind: input, shape index: {}]   ;;  %s861_s1 = inlined_call_operand.vmem [shape: f32[1,16,16], index: 1, kind: input, shape index: {}]   ;;  %s862_s2 = inlined_call_operand.vmem [shape: f32[6,16,16], index: 2, kind: output, shape index: {}]  }
   0x1   :  { %v13_v0 = vld [vmem:[%s860_s0 + $0x18] sm:$0xff]  ;;  %v371_v1 = vld [vmem:[%s860_s0 + $0xa8] sm:$0xff]  ;;  %v11_v2 = vld [vmem:[%s860_s0] sm:$0xff] }
   0x2   :  { %76 = vrot.lane.b32.xlu1 %v13_v0, %s418_s15  ;;  %v444_v3 = vadd.f32 %v371_v1, %v13_v0  ;;  %v369_v4 = vld [vmem:[%s860_s0 + $0x90] sm:$0xff]  ;;  %72 = vrot.lane.b32.xlu0 %v11_v2, %s418_s15  ;;  %v14_v6 = vld [vmem:[%s860_s0 + $0x20] sm:$0xff] }
   0x3   :  { %v450_v5 = vadd.f32 %v369_v4, %v11_v2  ;;  %v12_v7 = vld [vmem:[%s860_s0 + $0x8] sm:$0xff]  ;;  %v16_v8 = vld [vmem:[%s860_s0 + $0x38] sm:$0xff]  ;;  %v15_v9 = vld [vmem:[%s860_s0 + $0x30] sm:$0xff] }
   0x4   :  { %v18_v10 = vld [vmem:[%s860_s0 + $0x50] sm:$0xff]  ;;  %v17_v11 = vld [vmem:[%s860_s0 + $0x48] sm:$0xff]  ;;  %v19_v13 = vld [vmem:[%s860_s0 + $0x60] sm:$0xff] }
   0x5   :  { %v20_v12 = vld [vmem:[%s860_s0 + $0x68] sm:$0xff]  ;;  %v22_v14 = vld [vmem:[%s860_s0 + $0x80] sm:$0xff]  ;;  %v372_v15 = vld [vmem:[%s860_s0 + $0xb0] sm:$0xff] }
   0x6   :  { %78 = vrot.lane.b32.xlu1 %v14_v6, %s418_s15  ;;  %74 = vrot.lane.b32.xlu0 %v12_v7, %s418_s15  ;;  %v370_v16 = vld [vmem:[%s860_s0 + $0x98] sm:$0xff]  ;;  %v374_v17 = vld [vmem:[%s860_s0 + $0xc8] sm:$0xff]  ;;  %v494_v18 = vadd.f32 %v372_v15, %v14_v6 }
   0x7   :  { %v496_v19 = vadd.f32 %v370_v16, %v12_v7  ;;  %v498_v20 = vadd.f32 %v374_v17, %v16_v8  ;;  %v373_v21 = vld [vmem:[%s860_s0 + $0xc0] sm:$0xff]  ;;  %v375_v23 = vld [vmem:[%s860_s0 + $0xd8] sm:$0xff]  ;;  %v377_v28 = vld [vmem:[%s860_s0 + $0xf0] sm:$0xff] }
   0x8   :  { %v376_v22 = vld [vmem:[%s860_s0 + $0xe0] sm:$0xff]  ;;  %v509_v24 = vadd.f32 %v373_v21, %v15_v9  ;;  %v513_v26 = vadd.f32 %v375_v23, %v17_v11  ;;  %v378_v27 = vld [vmem:[%s860_s0 + $0xf8] sm:$0xff]  ;;  %v380_v29 = vld [vmem:[%s860_s0 + $0x110] sm:$0xff]  ;;  %v531_v32 = vadd.f32 %v377_v28, %v19_v13 }
   0x9   :  { %v511_v25 = vadd.f32 %v376_v22, %v18_v10  ;;  %v21_v30 = vld [vmem:[%s860_s0 + $0x78] sm:$0xff]  ;;  %v529_v31 = vadd.f32 %v378_v27, %v20_v12  ;;  %v533_v33 = vadd.f32 %v380_v29, %v22_v14  ;;  %v379_v34 = vld [vmem:[%s860_s0 + $0x108] sm:$0xff]  ;;  %v381_v37 = vld [vmem:[%s860_s0 + $0x120] sm:$0xff] }
   0xa   :  { %82 = vrot.lane.b32.xlu1 %v16_v8, %s418_s15  ;;  %80 = vrot.lane.b32.xlu0 %v15_v9, %s418_s15  ;;  %v538_v35 = vadd.f32 %v379_v34, %v21_v30  ;;  %v545_v36 = vld [vmem:[%s860_s0 + $0x128] sm:$0xff]  ;;  %v384_v38 = vld [vmem:[%s860_s0 + $0x140] sm:$0xff] }
   0xb   :  { %v383_v39 = vld [vmem:[%s860_s0 + $0x138] sm:$0xff]  ;;  %v569_v41 = vld [vmem:[%s860_s0 + $0x150] sm:$0xff]  ;;  %v583_v43 = vld [vmem:[%s860_s0 + $0x168] sm:$0xff] }
   0xc   :  { %v564_v40 = vld [vmem:[%s860_s0 + $0x158] sm:$0xff]  ;;  %v578_v42 = vld [vmem:[%s860_s0 + $0x170] sm:$0xff]  ;;  %v592_v44 = vld [vmem:[%s860_s0 + $0x188] sm:$0xff] }
   0xd   :  { %v597_v45 = vld [vmem:[%s860_s0 + $0x180] sm:$0xff]  ;;  %v611_v47 = vld [vmem:[%s860_s0 + $0x198] sm:$0xff]  ;;  %v620_v48 = vld [vmem:[%s860_s0 + $0x9] sm:$0xff] }
   0xe   :  { %86 = vrot.lane.b32.xlu1 %v18_v10, %s418_s15  ;;  %84 = vrot.lane.b32.xlu0 %v17_v11, %s418_s15  ;;  %v606_v46 = vld [vmem:[%s860_s0 + $0x1a0] sm:$0xff]  ;;  %v653_v53 = vld [vmem:[%s860_s0 + $0x31] sm:$0xff] }
   0xf   :  { %v625_v49 = vld [vmem:[%s860_s0 + $0x1] sm:$0xff]  ;;  %v639_v51 = vld [vmem:[%s860_s0 + $0x19] sm:$0xff]  ;;  %v662_v54 = vld [vmem:[%s860_s0 + $0x51] sm:$0xff] }
  0x10   :  { %v634_v50 = vld [vmem:[%s860_s0 + $0x21] sm:$0xff]  ;;  %v648_v52 = vld [vmem:[%s860_s0 + $0x39] sm:$0xff]  ;;  %v667_v55 = vld [vmem:[%s860_s0 + $0x49] sm:$0xff] }
  0x11   :  { %v676_v56 = vld [vmem:[%s860_s0 + $0x69] sm:$0xff]  ;;  %v681_v57 = vld [vmem:[%s860_s0 + $0x61] sm:$0xff]  ;;  %v695_v59 = vld [vmem:[%s860_s0 + $0x79] sm:$0xff] }
  0x12   :  { %90 = vrot.lane.b32.xlu1 %v20_v12, %s418_s15  ;;  %88 = vrot.lane.b32.xlu0 %v19_v13, %s418_s15  ;;  %v690_v58 = vld [vmem:[%s860_s0 + $0x81] sm:$0xff]  ;;  %v393_v0 = vld [vmem:[%s860_s0 + $0x1b0] sm:$0xff] }
  0x13   :  { %v395_v1 = vld [vmem:[%s860_s0 + $0x1c8] sm:$0xff]  ;;  %v396_v11 = vld [vmem:[%s860_s0 + $0x1d0] sm:$0xff]  ;;  %v397_v22 = vld [vmem:[%s860_s0 + $0x1e0] sm:$0xff] }
  0x14   :  { %v398_v21 = vld [vmem:[%s860_s0 + $0x1e8] sm:$0xff] }
  0x16   :  { %94 = vrot.lane.b32.xlu1 %v22_v14, %s418_s15  ;;  %92 = vrot.lane.b32.xlu0 %v21_v30, %s418_s15 }
  0x1a   :  { %184 = vrot.lane.b32.xlu1 %v545_v36, %s418_s15  ;;  %182 = vrot.lane.b32.xlu0 %v381_v37, %s418_s15 }
  0x1e   :  { %188 = vrot.lane.b32.xlu1 %v384_v38, %s418_s15  ;;  %186 = vrot.lane.b32.xlu0 %v383_v39, %s418_s15 }
  0x22   :  { %192 = vrot.lane.b32.xlu1 %v564_v40, %s418_s15  ;;  %190 = vrot.lane.b32.xlu0 %v569_v41, %s418_s15 }
  0x26   :  { %196 = vrot.lane.b32.xlu1 %v578_v42, %s418_s15  ;;  %194 = vrot.lane.b32.xlu0 %v583_v43, %s418_s15 }
  0x2a   :  { %200 = vrot.lane.b32.xlu1 %v592_v44, %s418_s15  ;;  %198 = vrot.lane.b32.xlu0 %v597_v45, %s418_s15 }
  0x2e   :  { %204 = vrot.lane.b32.xlu1 %v606_v46, %s418_s15  ;;  %202 = vrot.lane.b32.xlu0 %v611_v47, %s418_s15 }
  0x32   :  { %292 = vrot.lane.b32.xlu1 %v620_v48, %s418_s15  ;;  %290 = vrot.lane.b32.xlu0 %v625_v49, %s418_s15 }
  0x36   :  { %296 = vrot.lane.b32.xlu1 %v634_v50, %s418_s15  ;;  %294 = vrot.lane.b32.xlu0 %v639_v51, %s418_s15 }
  0x3a   :  { %300 = vrot.lane.b32.xlu1 %v648_v52, %s418_s15  ;;  %298 = vrot.lane.b32.xlu0 %v653_v53, %s418_s15 }
  0x3e   :  { %304 = vrot.lane.b32.xlu1 %v662_v54, %s418_s15  ;;  %302 = vrot.lane.b32.xlu0 %v667_v55, %s418_s15 }
  0x42   :  { %308 = vrot.lane.b32.xlu1 %v676_v56, %s418_s15  ;;  %306 = vrot.lane.b32.xlu0 %v681_v57, %s418_s15 }
  0x46   :  { %312 = vrot.lane.b32.xlu1 %v690_v58, %s418_s15  ;;  %310 = vrot.lane.b32.xlu0 %v695_v59, %s418_s15 }
  0x74   :  { %v77_v60 = vpop.permute.xlu1 %76  ;;  %v73_v61 = vpop.permute.xlu0 %72 }
  0x75   :  { %v110_v62 = vadd.f32 %v77_v60, %v444_v3  ;;  %v108_v63 = vadd.f32 %v73_v61, %v450_v5  ;;  %v394_v5 = vld [vmem:[%s860_s0 + $0x1b8] sm:$0xff] }
  0x77   :  { %v135_v2 = vadd.f32 %v383_v39, %v110_v62  ;;  %v133_v4 = vadd.f32 %v381_v37, %v108_v63  ;;  %v399_v37 = vld [vmem:[%s860_s0 + $0x1f8] sm:$0xff]  ;;  %v401_v63 = vld [vmem:[%s860_s0 + $0x210] sm:$0xff] }
  0x78   :  { %v79_v6 = vpop.permute.xlu1 %78  ;;  %v75_v7 = vpop.permute.xlu0 %74  ;;  %v402_v62 = vld [vmem:[%s860_s0 + $0x218] sm:$0xff] }
  0x79   :  { %v111_v8 = vadd.f32 %v79_v6, %v494_v18  ;;  %v109_v9 = vadd.f32 %v75_v7, %v496_v19  ;;  %v158_v10 = vadd.f32 %v393_v0, %v133_v4  ;;  %v160_v3 = vadd.f32 %v395_v1, %v135_v2  ;;  %v404_v6 = vld [vmem:[%s860_s0 + $0x230] sm:$0xff]  ;;  %v403_v7 = vld [vmem:[%s860_s0 + $0x228] sm:$0xff] }
  0x7b   :  { %v136_v12 = vadd.f32 %v384_v38, %v111_v8  ;;  %v134_v13 = vadd.f32 %v545_v36, %v109_v9  ;;  %v400_v36 = vld [vmem:[%s860_s0 + $0x200] sm:$0xff] }
  0x7c   :  { %v83_v14 = vpop.permute.xlu1 %82  ;;  %v81_v15 = vpop.permute.xlu0 %80 }
  0x7d   :  { %v113_v16 = vadd.f32 %v83_v14, %v498_v20  ;;  %v112_v17 = vadd.f32 %v81_v15, %v509_v24  ;;  %v159_v18 = vadd.f32 %v394_v5, %v134_v13  ;;  %v161_v19 = vadd.f32 %v396_v11, %v136_v12  ;;  %v406_v12 = vld [vmem:[%s860_s0 + $0x99] sm:$0xff]  ;;  %v405_v13 = vld [vmem:[%s860_s0 + $0x91] sm:$0xff] }
  0x7f   :  { %v138_v23 = vadd.f32 %v564_v40, %v113_v16  ;;  %v137_v27 = vadd.f32 %v569_v41, %v112_v17 }
  0x80   :  { %v87_v28 = vpop.permute.xlu1 %86  ;;  %v85_v29 = vpop.permute.xlu0 %84 }
  0x81   :  { %v115_v20 = vadd.f32 %v87_v28, %v511_v25  ;;  %v114_v24 = vadd.f32 %v85_v29, %v513_v26  ;;  %v163_v30 = vadd.f32 %v398_v21, %v138_v23  ;;  %v162_v34 = vadd.f32 %v397_v22, %v137_v27  ;;  %v408_v21 = vld [vmem:[%s860_s0 + $0xb1] sm:$0xff]  ;;  %v407_v22 = vld [vmem:[%s860_s0 + $0xa9] sm:$0xff] }
  0x83   :  { %v140_v38 = vadd.f32 %v578_v42, %v115_v20  ;;  %v139_v39 = vadd.f32 %v583_v43, %v114_v24  ;;  %v410_v20 = vld [vmem:[%s860_s0 + $0xc9] sm:$0xff]  ;;  %v409_v24 = vld [vmem:[%s860_s0 + $0xc1] sm:$0xff] }
  0x84   :  { %v91_v40 = vpop.permute.xlu1 %90  ;;  %v89_v41 = vpop.permute.xlu0 %88 }
  0x85   :  { %v117_v25 = vadd.f32 %v91_v40, %v529_v31  ;;  %v116_v26 = vadd.f32 %v89_v41, %v531_v32  ;;  %v165_v60 = vadd.f32 %v400_v36, %v140_v38  ;;  %v164_v61 = vadd.f32 %v399_v37, %v139_v39  ;;  %v412_v40 = vld [vmem:[%s860_s0 + $0xe1] sm:$0xff]  ;;  %v411_v41 = vld [vmem:[%s860_s0 + $0xd9] sm:$0xff] }
  0x87   :  { %v142_v42 = vadd.f32 %v592_v44, %v117_v25  ;;  %v141_v43 = vadd.f32 %v597_v45, %v116_v26 }
  0x88   :  { %v95_v0 = vpop.permute.xlu1 %94  ;;  %v93_v1 = vpop.permute.xlu0 %92 }
  0x89   :  { %v119_v31 = vadd.f32 %v95_v0, %v533_v33  ;;  %v118_v32 = vadd.f32 %v93_v1, %v538_v35  ;;  %v167_v2 = vadd.f32 %v402_v62, %v142_v42  ;;  %v166_v4 = vadd.f32 %v401_v63, %v141_v43  ;;  %v414_v42 = vld [vmem:[%s860_s0 + $0xf9] sm:$0xff]  ;;  %v413_v43 = vld [vmem:[%s860_s0 + $0xf1] sm:$0xff] }
  0x8b   :  { %v144_v44 = vadd.f32 %v606_v46, %v119_v31  ;;  %v143_v45 = vadd.f32 %v611_v47, %v118_v32 }
  0x8c   :  { %v185_v8 = vpop.permute.xlu1 %184  ;;  %v183_v9 = vpop.permute.xlu0 %182 }
  0x8d   :  { %v219_v5 = vadd.f32 %v185_v8, %v159_v18  ;;  %v218_v33 = vadd.f32 %v183_v9, %v158_v10  ;;  %v169_v11 = vadd.f32 %v404_v6, %v144_v44  ;;  %v168_v35 = vadd.f32 %v403_v7, %v143_v45  ;;  %v416_v6 = vld [vmem:[%s860_s0 + $0x111] sm:$0xff]  ;;  %v415_v7 = vld [vmem:[%s860_s0 + $0x109] sm:$0xff]  ;;  %v338_v8 = vld [vmem:[%s861_s1] sm:$0xff] }
  0x8f   :  { %v243_v14 = vadd.f32 %v620_v48, %v219_v5  ;;  %v242_v46 = vadd.f32 %v625_v49, %v218_v33 }
  0x90   :  { %v189_v15 = vpop.permute.xlu1 %188  ;;  %v187_v47 = vpop.permute.xlu0 %186 }
  0x91   :  { %v221_v16 = vadd.f32 %v189_v15, %v161_v19  ;;  %v220_v17 = vadd.f32 %v187_v47, %v160_v3  ;;  %v267_v18 = vadd.f32 %v406_v12, %v243_v14  ;;  %v266_v10 = vadd.f32 %v405_v13, %v242_v46 }
  0x93   :  { %v245_v23 = vadd.f32 %v634_v50, %v221_v16  ;;  %v244_v48 = vadd.f32 %v639_v51, %v220_v17 }
  0x94   :  { %v193_v27 = vpop.permute.xlu1 %192  ;;  %v191_v49 = vpop.permute.xlu0 %190 }
  0x95   :  { %v223_v28 = vadd.f32 %v193_v27, %v163_v30  ;;  %v222_v29 = vadd.f32 %v191_v49, %v162_v34  ;;  %v269_v19 = vadd.f32 %v408_v21, %v245_v23  ;;  %v268_v3 = vadd.f32 %v407_v22, %v244_v48 }
  0x97   :  { %v247_v36 = vadd.f32 %v648_v52, %v223_v28  ;;  %v246_v50 = vadd.f32 %v653_v53, %v222_v29 }
  0x98   :  { %v197_v37 = vpop.permute.xlu1 %196  ;;  %v195_v51 = vpop.permute.xlu0 %194 }
  0x99   :  { %v225_v38 = vadd.f32 %v197_v37, %v165_v60  ;;  %v224_v39 = vadd.f32 %v195_v51, %v164_v61  ;;  %v271_v30 = vadd.f32 %v410_v20, %v247_v36  ;;  %v270_v34 = vadd.f32 %v409_v24, %v246_v50 }
  0x9b   :  { %v249_v25 = vadd.f32 %v662_v54, %v225_v38  ;;  %v248_v52 = vadd.f32 %v667_v55, %v224_v39 }
  0x9c   :  { %v201_v26 = vpop.permute.xlu1 %200  ;;  %v199_v53 = vpop.permute.xlu0 %198 }
  0x9d   :  { %v227_v62 = vadd.f32 %v201_v26, %v167_v2  ;;  %v226_v63 = vadd.f32 %v199_v53, %v166_v4  ;;  %v273_v60 = vadd.f32 %v412_v40, %v249_v25  ;;  %v272_v61 = vadd.f32 %v411_v41, %v248_v52 }
  0x9f   :  { %v251_v0 = vadd.f32 %v676_v56, %v227_v62  ;;  %v250_v54 = vadd.f32 %v681_v57, %v226_v63  ;;  %v339_v57 = vld [vmem:[%s861_s1 + $0x8] sm:$0xff] }
  0xa0   :  { %v205_v1 = vpop.permute.xlu1 %204  ;;  %v203_v55 = vpop.permute.xlu0 %202 }
  0xa1   :  { %v229_v31 = vadd.f32 %v205_v1, %v169_v11  ;;  %v228_v32 = vadd.f32 %v203_v55, %v168_v35  ;;  %v275_v2 = vadd.f32 %v414_v42, %v251_v0  ;;  %v274_v4 = vadd.f32 %v413_v43, %v250_v54 }
  0xa3   :  { %v253_v44 = vadd.f32 %v690_v58, %v229_v31  ;;  %v252_v56 = vadd.f32 %v695_v59, %v228_v32 }
  0xa4   :  { %v293_v45 = vpop.permute.xlu1 %292  ;;  %v291_v9 = vpop.permute.xlu0 %290 }
  0xa5   :  { %v327_v5 = vadd.f32 %v293_v45, %v267_v18  ;;  %v326_v33 = vadd.f32 %v291_v9, %v266_v10  ;;  %v277_v11 = vadd.f32 %v416_v6, %v253_v44  ;;  %v276_v35 = vadd.f32 %v415_v7, %v252_v56 }
  0xa7   :  { %v341_v12 = vmul.f32 %v339_v57, %v327_v5  ;;  %v340_v13 = vmul.f32 %v338_v8, %v326_v33 }
  0xa8   :  { %v297_v58 = vpop.permute.xlu1 %296  ;;  %v295_v14 = vpop.permute.xlu0 %294 }
  0xa9   :  { %354 = vst.msk [vmem:[%s862_s2 + $0x8] sm:$0xff] %vm352_vm0, %v341_v12  ;;  %353 = vst.msk [vmem:[%s862_s2] sm:$0xff] %vm352_vm0, %v340_v13  ;;  %v329_v59 = vadd.f32 %v297_v58, %v269_v19  ;;  %v328_v46 = vadd.f32 %v295_v14, %v268_v3 }
  0xab   :  { %v343_v15 = vmul.f32 %v339_v57, %v329_v59  ;;  %v342_v47 = vmul.f32 %v338_v8, %v328_v46 }
  0xac   :  { %v301_v16 = vpop.permute.xlu1 %300  ;;  %v299_v17 = vpop.permute.xlu0 %298 }
  0xad   :  { %356 = vst.msk [vmem:[%s862_s2 + $0x18] sm:$0xff] %vm352_vm0, %v343_v15  ;;  %355 = vst.msk [vmem:[%s862_s2 + $0x10] sm:$0xff] %vm352_vm0, %v342_v47  ;;  %v331_v18 = vadd.f32 %v301_v16, %v271_v30  ;;  %v330_v10 = vadd.f32 %v299_v17, %v270_v34 }
  0xaf   :  { %v345_v21 = vmul.f32 %v339_v57, %v331_v18  ;;  %v344_v22 = vmul.f32 %v338_v8, %v330_v10 }
  0xb0   :  { %v305_v23 = vpop.permute.xlu1 %304  ;;  %v303_v48 = vpop.permute.xlu0 %302 }
  0xb1   :  { %358 = vst.msk [vmem:[%s862_s2 + $0x28] sm:$0xff] %vm352_vm0, %v345_v21  ;;  %357 = vst.msk [vmem:[%s862_s2 + $0x20] sm:$0xff] %vm352_vm0, %v344_v22  ;;  %v333_v27 = vadd.f32 %v305_v23, %v273_v60  ;;  %v332_v49 = vadd.f32 %v303_v48, %v272_v61 }
  0xb3   :  { %v347_v28 = vmul.f32 %v339_v57, %v333_v27  ;;  %v346_v29 = vmul.f32 %v338_v8, %v332_v49 }
  0xb4   :  { %v309_v19 = vpop.permute.xlu1 %308  ;;  %v307_v3 = vpop.permute.xlu0 %306 }
  0xb5   :  { %360 = vst.msk [vmem:[%s862_s2 + $0x38] sm:$0xff] %vm352_vm0, %v347_v28  ;;  %359 = vst.msk [vmem:[%s862_s2 + $0x30] sm:$0xff] %vm352_vm0, %v346_v29  ;;  %v335_v20 = vadd.f32 %v309_v19, %v275_v2  ;;  %v334_v24 = vadd.f32 %v307_v3, %v274_v4 }
  0xb7   :  { %v349_v36 = vmul.f32 %v339_v57, %v335_v20  ;;  %v348_v50 = vmul.f32 %v338_v8, %v334_v24 }
  0xb8   :  { %v313_v37 = vpop.permute.xlu1 %312  ;;  %v311_v51 = vpop.permute.xlu0 %310 }
  0xb9   :  { %362 = vst.msk [vmem:[%s862_s2 + $0x48] sm:$0xff] %vm352_vm0, %v349_v36  ;;  %361 = vst.msk [vmem:[%s862_s2 + $0x40] sm:$0xff] %vm352_vm0, %v348_v50  ;;  %v337_v38 = vadd.f32 %v313_v37, %v277_v11  ;;  %v336_v39 = vadd.f32 %v311_v51, %v276_v35 }
  0xbb   :  { %v351_v30 = vmul.f32 %v339_v57, %v337_v38  ;;  %v350_v34 = vmul.f32 %v338_v8, %v336_v39 }
  0xbd   :  { %364 = vst.msk [vmem:[%s862_s2 + $0x58] sm:$0xff] %vm352_vm0, %v351_v30  ;;  %363 = vst.msk [vmem:[%s862_s2 + $0x50] sm:$0xff] %vm352_vm0, %v350_v34 }

// kernel: discriminator_forward.14
= control target key start
LH: loop header
LB: loop body
LE: loop exit
PB: predicated region body
PF: predicated region fallthrough
CT: control target
= control target key end

     0   :  { %v124_v0 = vmov 0.0   ;;  %vm125_vm0 = vmmov 0   ;;  %v126_v2 = vmov 0   ;;  %vm46_vm1 = vcmask 392192   ;;  %s165_s1 = inlined_call_operand.vmem [shape: bf16[48,128], index: 1, kind: input, shape index: {}]   ;;  %s166_s2 = inlined_call_operand.vmem [shape: f32[8,1], index: 2, kind: input, shape index: {}]   ;;  %s167_s0 = inlined_call_operand.vmem [shape: bf16[8,48], index: 0, kind: input, shape index: {}]   ;;  %s168_s3 = inlined_call_operand.vmem [shape: bf16[8,128], index: 3, kind: output, shape index: {}]  }
   0x1   :  { %107 = vmatprep.subr.bf16.mxu0 %v124_v0  ;;  %v121_v1 = vld [vmem:[%s165_s1] sm:$0xff]   ;;  %113 = vmatprep.mubr.msk.bf16.mxu0 %vm125_vm0, %v124_v0  ;;  %v122_v3 = vld [vmem:[%s165_s1 + $0x8] sm:$0xff]   ;;  %v123_v5 = vld [vmem:[%s165_s1 + $0x10] sm:$0xff]  }
   0x2   :  { %120 = vset.pattern.permute.xlu0 %v126_v2  ;;  %108 = vmatpush3.bf16.msra.mxu0 %v121_v1  ;;  %v22_v4 = vld [vmem:[%s166_s2] sm:$0xff] }
   0x3   :  { %109 = vmatprep.subr.bf16.mxu0 %v124_v0  ;;  %25 = vperm.xlu0 %120, %v22_v4   ;;  %v15_v6 = vld [vmem:[%s167_s0] sm:$0xf] }
   0x6   :  { %110 = vmatpush3.bf16.msra.mxu0 %v122_v3 }
   0x7   :  { %111 = vmatprep.subr.bf16.mxu0 %v124_v0 }
   0xa   :  { %112 = vmatpush3.bf16.msra.mxu0 %v123_v5 }
   0xd   :  { %114 = vmatmul.mubr.msk.bf16.vlgmr.msra.gmra.mrb[0].mxu0 %vm46_vm1, %v15_v6 }
  0x82   :  { %v26_v7 = vpop.permute.xlu0 %25 }
  0xe0   :  { %v84_v8 = vpop.f32.mrb[0].mxu0 }
  0xe1   :  { %v85_v9 = vadd.f32 %v84_v8, %v26_v7  ;;  %v115_v10 = vpop.f32.mrb[1].mxu0 }
  0xe2   :  { %v87_v11 = vpop.f32.mrb[2].mxu0 }
  0xe3   :  { %vm90_vm2 = vcmp.ge.f32.partialorder %v85_v9, 0.0  ;;  %v91_v12 = vmul.f32 0.2, %v85_v9  ;;  %v116_v13 = vpop.f32.mrb[3].mxu0 }
  0xe5   :  { %v92_v14 = vsel %vm90_vm2, %v85_v9, %v91_v12 }
  0xe6   :  { %v93_v15 = vpack.c.bf16 %v92_v14, %v92_v14 }
  0xe8   :  { %94 = vst [vmem:[%s168_s3] sm:$0xf] %v93_v15 }

// kernel: discriminator_forward.15
= control target key start
LH: loop header
LB: loop body
LE: loop exit
PB: predicated region body
PF: predicated region fallthrough
CT: control target
= control target key end

     0   :  { %v220_v0 = vmov 0.0   ;;  %vm221_vm0 = vmmov 0   ;;  %v222_v2 = vmov 0   ;;  %s279_s1 = inlined_call_operand.vmem [shape: bf16[128,128], index: 1, kind: input, shape index: {}]   ;;  %s280_s2 = inlined_call_operand.vmem [shape: f32[16,1], index: 2, kind: input, shape index: {}]   ;;  %s281_s0 = inlined_call_operand.vmem [shape: bf16[16,128], index: 0, kind: input, shape index: {}]   ;;  %s282_s3 = inlined_call_operand.vmem [shape: bf16[16,128], index: 3, kind: output, shape index: {}]  }
   0x1   :  { %187 = vmatprep.subr.bf16.mxu0 %v220_v0  ;;  %v211_v1 = vld [vmem:[%s279_s1] sm:$0xff]   ;;  %203 = vmatprep.mubr.msk.bf16.mxu0 %vm221_vm0, %v220_v0  ;;  %v212_v3 = vld [vmem:[%s279_s1 + $0x8] sm:$0xff]   ;;  %v213_v4 = vld [vmem:[%s279_s1 + $0x10] sm:$0xff]  }
   0x2   :  { %210 = vset.pattern.permute.xlu0 %v222_v2  ;;  %188 = vmatpush3.bf16.msra.mxu0 %v211_v1  ;;  %v33_v5 = vld [vmem:[%s280_s2] sm:$0xff]  ;;  %v214_v6 = vld [vmem:[%s279_s1 + $0x18] sm:$0xff]   ;;  %v34_v7 = vld [vmem:[%s280_s2 + $0x8] sm:$0xff] }
   0x3   :  { %189 = vmatprep.subr.bf16.mxu0 %v220_v0  ;;  %37 = vperm.xlu0 %210, %v33_v5   ;;  %v215_v8 = vld [vmem:[%s279_s1 + $0x20] sm:$0xff]   ;;  %v216_v9 = vld [vmem:[%s279_s1 + $0x28] sm:$0xff]   ;;  %v217_v10 = vld [vmem:[%s279_s1 + $0x30] sm:$0xff]  }
   0x4   :  { %v218_v11 = vld [vmem:[%s279_s1 + $0x38] sm:$0xff]   ;;  %v219_v12 = vld [vmem:[%s281_s0] sm:$0xff]  }
   0x6   :  { %190 = vmatpush3.bf16.msra.mxu0 %v212_v3 }
   0x7   :  { %191 = vmatprep.subr.bf16.mxu0 %v220_v0  ;;  %42 = vperm.xlu0 %210, %v34_v7  }
   0xa   :  { %192 = vmatpush3.bf16.msra.mxu0 %v213_v4 }
   0xb   :  { %193 = vmatprep.subr.bf16.mxu0 %v220_v0 }
   0xe   :  { %194 = vmatpush3.bf16.msra.mxu0 %v214_v6 }
   0xf   :  { %195 = vmatprep.subr.bf16.mxu0 %v220_v0 }
  0x12   :  { %196 = vmatpush3.bf16.msra.mxu0 %v215_v8 }
  0x13   :  { %197 = vmatprep.subr.bf16.mxu0 %v220_v0 }
  0x16   :  { %198 = vmatpush3.bf16.msra.mxu0 %v216_v9 }
  0x17   :  { %199 = vmatprep.subr.bf16.mxu0 %v220_v0 }
  0x1a   :  { %200 = vmatpush3.bf16.msra.mxu0 %v217_v10 }
  0x1b   :  { %201 = vmatprep.subr.bf16.mxu0 %v220_v0 }
  0x1e   :  { %202 = vmatpush3.bf16.msra.mxu0 %v218_v11 }
  0x21   :  { %204 = vmatmul.mubr.bf16.vlgmr.msra.gmra.mrb[0].mxu0 %v219_v12 }
  0x82   :  { %v38_v13 = vpop.permute.xlu0 %37 }
  0x86   :  { %v43_v17 = vpop.permute.xlu0 %42 }
  0xf4   :  { %v133_v14 = vpop.f32.mrb[0].mxu0 }
  0xf5   :  { %v134_v15 = vadd.f32 %v133_v14, %v38_v13  ;;  %v205_v16 = vpop.f32.mrb[1].mxu0 }
  0xf6   :  { %v136_v18 = vpop.f32.mrb[2].mxu0 }
  0xf7   :  { %v142_v19 = vmul.f32 0.2, %v134_v15  ;;  %v137_v20 = vadd.f32 %v136_v18, %v43_v17  ;;  %v206_v21 = vpop.f32.mrb[3].mxu0  ;;  %vm140_vm1 = vcmp.ge.f32.partialorder %v134_v15, 0.0 }
  0xf9   :  { %vm141_vm2 = vcmp.ge.f32.partialorder %v137_v20, 0.0  ;;  %v143_v22 = vmul.f32 0.2, %v137_v20  ;;  %v144_v23 = vsel %vm140_vm1, %v134_v15, %v142_v19 }
  0xfb   :  { %v145_v24 = vsel %vm141_vm2, %v137_v20, %v143_v22 }
  0xfc   :  { %v176_v25 = vpack.c.bf16 %v145_v24, %v144_v23 }
  0xfe   :  { %177 = vst [vmem:[%s282_s3] sm:$0xff] %v176_v25  }

// kernel: discriminator_forward.16
= control target key start
LH: loop header
LB: loop body
LE: loop exit
PB: predicated region body
PF: predicated region fallthrough
CT: control target
= control target key end

     0   :  { %v384_v1 = vmov 0   ;;  %s483_s1 = inlined_call_operand.vmem [shape: bf16[256,128], index: 1, kind: input, shape index: {}]   ;;  %s484_s0 = inlined_call_operand.vmem [shape: bf16[32,256], index: 0, kind: input, shape index: {}]   ;;  %s485_s2 = inlined_call_operand.vmem [shape: f32[32,1], index: 2, kind: input, shape index: {}]   ;;  %s486_s3 = inlined_call_operand.vmem [shape: bf16[32,128], index: 3, kind: output, shape index: {}]  }
   0x1   :  { %v362_v0 = vld [vmem:[%s483_s1 + $0x40] sm:$0xff]   ;;  %361 = vset.pattern.permute.xlu1 %v384_v1  ;;  %360 = vset.pattern.permute.xlu0 %v384_v1  ;;  %v364_v3 = vld [vmem:[%s483_s1 + $0x48] sm:$0xff]   ;;  %v366_v5 = vld [vmem:[%s483_s1 + $0x50] sm:$0xff]  }
   0x2   :  { %v363_v2 = vld [vmem:[%s483_s1] sm:$0xff]   ;;  %315 = vmatprep.subr.bf16.mxu0 %v362_v0  ;;  %343 = vmatprep.subr.bf16.mxu1 %v362_v0  ;;  %v365_v4 = vld [vmem:[%s483_s1 + $0x8] sm:$0xff]   ;;  %v367_v6 = vld [vmem:[%s483_s1 + $0x10] sm:$0xff]  }
   0x3   :  { %316 = vmatpush3.bf16.msra.mxu0 %v363_v2  ;;  %351 = vmatpush3.bf16.msra.mxu1 %v363_v2  ;;  %v368_v7 = vld [vmem:[%s483_s1 + $0x58] sm:$0xff]   ;;  %v370_v9 = vld [vmem:[%s483_s1 + $0x60] sm:$0xff]   ;;  %v372_v11 = vld [vmem:[%s483_s1 + $0x68] sm:$0xff]  }
   0x4   :  { %317 = vmatprep.subr.bf16.mxu0 %v364_v3  ;;  %344 = vmatprep.subr.bf16.mxu1 %v364_v3  ;;  %v369_v8 = vld [vmem:[%s483_s1 + $0x18] sm:$0xff]   ;;  %v371_v10 = vld [vmem:[%s483_s1 + $0x20] sm:$0xff]   ;;  %v373_v14 = vld [vmem:[%s483_s1 + $0x28] sm:$0xff]  }
   0x5   :  { %v380_v12 = vld [vmem:[%s484_s0 + $0x4] ss:$8 sps:$4 sm:$0xff]   ;;  %v383_v13 = vld [vmem:[%s484_s0 + $0x14] ss:$8 sps:$4 sm:$0xff]   ;;  %v378_v23 = vld [vmem:[%s484_s0] ss:$8 sps:$4 sm:$0xff]  }
   0x6   :  { %v53_v15 = vld [vmem:[%s485_s2 + $0x10] sm:$0xff]  ;;  %v51_v16 = vld [vmem:[%s485_s2] sm:$0xff]  ;;  %223 = vmatprep.mubr.bf16.mxu0 %v380_v12  ;;  %231 = vmatprep.mubr.bf16.mxu1 %v383_v13  ;;  %v54_v19 = vld [vmem:[%s485_s2 + $0x18] sm:$0xff] }
   0x7   :  { %318 = vmatpush3.bf16.msra.mxu0 %v365_v4  ;;  %352 = vmatpush3.bf16.msra.mxu1 %v365_v4  ;;  %v374_v17 = vld [vmem:[%s483_s1 + $0x70] sm:$0xff]   ;;  %v52_v20 = vld [vmem:[%s485_s2 + $0x8] sm:$0xff]  ;;  %v376_v21 = vld [vmem:[%s483_s1 + $0x78] sm:$0xff]  }
   0x8   :  { %319 = vmatprep.subr.bf16.mxu0 %v366_v5  ;;  %345 = vmatprep.subr.bf16.mxu1 %v366_v5  ;;  %v375_v18 = vld [vmem:[%s483_s1 + $0x30] sm:$0xff]   ;;  %v377_v22 = vld [vmem:[%s483_s1 + $0x38] sm:$0xff]  }
   0x9   :  { %67 = vperm.xlu1 %361, %v53_v15   ;;  %57 = vperm.xlu0 %360, %v51_v16   ;;  %v381_v24 = vld [vmem:[%s484_s0 + $0x10] ss:$8 sps:$4 sm:$0xff]  }
   0xb   :  { %320 = vmatpush3.bf16.msra.mxu0 %v367_v6  ;;  %353 = vmatpush3.bf16.msra.mxu1 %v367_v6 }
   0xc   :  { %321 = vmatprep.subr.bf16.mxu0 %v368_v7  ;;  %346 = vmatprep.subr.bf16.mxu1 %v368_v7 }
   0xd   :  { %72 = vperm.xlu1 %361, %v54_v19   ;;  %62 = vperm.xlu0 %360, %v52_v20  }
   0xf   :  { %322 = vmatpush3.bf16.msra.mxu0 %v369_v8  ;;  %354 = vmatpush3.bf16.msra.mxu1 %v369_v8 }
  0x10   :  { %323 = vmatprep.subr.bf16.mxu0 %v370_v9  ;;  %347 = vmatprep.subr.bf16.mxu1 %v370_v9 }
  0x13   :  { %324 = vmatpush3.bf16.msra.mxu0 %v371_v10  ;;  %355 = vmatpush3.bf16.msra.mxu1 %v371_v10 }
  0x14   :  { %325 = vmatprep.subr.bf16.mxu0 %v372_v11  ;;  %348 = vmatprep.subr.bf16.mxu1 %v372_v11 }
  0x17   :  { %326 = vmatpush3.bf16.msra.mxu0 %v373_v14  ;;  %356 = vmatpush3.bf16.msra.mxu1 %v373_v14 }
  0x18   :  { %327 = vmatprep.subr.bf16.mxu0 %v374_v17  ;;  %349 = vmatprep.subr.bf16.mxu1 %v374_v17 }
  0x1b   :  { %328 = vmatpush3.bf16.msra.mxu0 %v375_v18  ;;  %357 = vmatpush3.bf16.msra.mxu1 %v375_v18 }
  0x1c   :  { %329 = vmatprep.subr.bf16.mxu0 %v376_v21  ;;  %350 = vmatprep.subr.bf16.mxu1 %v376_v21 }
  0x1f   :  { %330 = vmatpush3.bf16.msra.mxu0 %v377_v22  ;;  %358 = vmatpush3.bf16.msra.mxu1 %v377_v22 }
  0x22   :  { %224 = vmatmul.mubr.bf16.vlgmr.msra.gmra.mrb[0].mxu0 %v378_v23  ;;  %232 = vmatmul.mubr.bf16.vlgmr.msra.gmra.mrb[0].mxu1 %v381_v24 }
  0x88   :  { %v68_v25 = vpop.permute.xlu1 %67  ;;  %v58_v26 = vpop.permute.xlu0 %57 }
  0x8c   :  { %v73_v41 = vpop.permute.xlu1 %72  ;;  %v63_v42 = vpop.permute.xlu0 %62 }
  0xf5   :  { %v331_v27 = vpop.f32.mrb[0].mxu0  ;;  %v337_v28 = vpop.f32.mrb[0].mxu1 }
  0xf6   :  { %v332_v29 = vpop.f32.mrb[1].mxu0  ;;  %v338_v30 = vpop.f32.mrb[1].mxu1 }
  0xf7   :  { %v333_v31 = vadd.f32 %v332_v29, %v331_v27  ;;  %v339_v32 = vadd.f32 %v338_v30, %v337_v28  ;;  %v334_v33 = vpop.f32.mrb[2].mxu0  ;;  %v340_v34 = vpop.f32.mrb[2].mxu1 }
  0xf8   :  { %v335_v35 = vpop.f32.mrb[3].mxu0  ;;  %v341_v36 = vpop.f32.mrb[3].mxu1 }
  0xf9   :  { %v226_v37 = vadd.f32 %v333_v31, %v58_v26  ;;  %v234_v38 = vadd.f32 %v339_v32, %v68_v25  ;;  %v336_v39 = vadd.f32 %v335_v35, %v334_v33  ;;  %v342_v40 = vadd.f32 %v341_v36, %v340_v34 }
  0xfb   :  { %v244_v43 = vmul.f32 0.2, %v226_v37  ;;  %v246_v44 = vmul.f32 0.2, %v234_v38  ;;  %v229_v45 = vadd.f32 %v336_v39, %v63_v42  ;;  %v237_v46 = vadd.f32 %v342_v40, %v73_v41 }
  0xfc   :  { %vm240_vm0 = vcmp.ge.f32.partialorder %v226_v37, 0.0  ;;  %vm242_vm1 = vcmp.ge.f32.partialorder %v234_v38, 0.0 }
  0xfd   :  { %vm241_vm2 = vcmp.ge.f32.partialorder %v229_v45, 0.0  ;;  %v245_v47 = vmul.f32 0.2, %v229_v45  ;;  %vm243_vm3 = vcmp.ge.f32.partialorder %v237_v46, 0.0  ;;  %v247_v48 = vmul.f32 0.2, %v237_v46 }
  0xfe   :  { %v248_v49 = vsel %vm240_vm0, %v226_v37, %v244_v43  ;;  %v250_v50 = vsel %vm242_vm1, %v234_v38, %v246_v44 }
  0xff   :  { %v249_v51 = vsel %vm241_vm2, %v229_v45, %v245_v47  ;;  %v251_v52 = vsel %vm243_vm3, %v237_v46, %v247_v48 }
 0x100   :  { %v307_v53 = vpack.c.bf16 %v249_v51, %v248_v49  ;;  %v312_v54 = vpack.c.bf16 %v251_v52, %v250_v50 }
 0x102   :  { %308 = vst [vmem:[%s486_s3] sm:$0xff] %v307_v53   ;;  %314 = vst [vmem:[%s486_s3 + $0x8] sm:$0xff] %v312_v54  }

// kernel: discriminator_forward.17
= control target key start
LH: loop header
LB: loop body
LE: loop exit
PB: predicated region body
PF: predicated region fallthrough
CT: control target
= control target key end

     0   :  { %vm33_vm0 = vcmask 15360   ;;  %v435_v1 = vmov 0.0   ;;  %vm65_vm1 = vcmask 261120   ;;  %vm436_vm2 = vmmov 0   ;;  %s558_s1 = inlined_call_operand.vmem [shape: bf16[128,2], index: 1, kind: input, shape index: {}]   ;;  %s559_s0 = inlined_call_operand.vmem [shape: bf16[32,128], index: 0, kind: input, shape index: {}]   ;;  %s560_s2 = inlined_call_operand.vmem [shape: bf16[1,32], index: 2, kind: input, shape index: {}]   ;;  %s561_s3 = inlined_call_operand.<no memory space> [shape: f32[1,1], index: 3, kind: input, shape index: {}]   ;;  %s562_s5 = inlined_call_operand.vmem [shape: f32[2,1], index: 5, kind: input, shape index: {}]   ;;  %s563_s8 = inlined_call_operand.vmem [shape: f32[32,2], index: 8, kind: output, shape index: {2}]   ;;  %s564_s4 = inlined_call_operand.vmem [shape: f32[2,32], index: 4, kind: input, shape index: {}]   ;;  %s565_s7 = inlined_call_operand.vmem [shape: f32[1,128], index: 7, kind: output, shape index: {1}]   ;;  %s566_s6 = inlined_call_operand.vmem [shape: f32[2,2], index: 6, kind: output, shape index: {0}]  }
   0x1   :  { %v425_v0 = vld [vmem:[%s558_s1] sm:$0xff]   ;;  %36 = vst.msk [vmem:[#allocation2 + $0x10] sm:$0xff] %vm33_vm0, %v435_v1  ;;  %34 = vst.msk [vmem:[#allocation2] sm:$0xff] %vm33_vm0, %v435_v1  ;;  %375 = vmatprep.subr.bf16.mxu0 %v435_v1  ;;  %v426_v2 = vld [vmem:[%s558_s1 + $0x8] sm:$0xff]   ;;  %379 = vmatprep.mubr.msk.bf16.mxu0 %vm436_vm2, %v435_v1  ;;  %v437_v12 = vmov 0.0|0.0   ;;  %v438_v13 = vmov 0   ;;  %v14_v14 = vstv %s561_s3  ;;  %v49_v40 = vlaneseq }
   0x2   :  { %35 = vst.msk [vmem:[#allocation2 + $0x8] sm:$0xff] %vm33_vm0, %v435_v1  ;;  %37 = vst.msk [vmem:[#allocation2 + $0x18] sm:$0xff] %vm33_vm0, %v435_v1  ;;  %383 = vmatprep.subr.bf16.mxu1 %v425_v0  ;;  %v427_v3 = vld [vmem:[%s558_s1 + $0x10] sm:$0xff]   ;;  %v428_v4 = vld [vmem:[%s558_s1 + $0x18] sm:$0xff]   ;;  %424 = vset.pattern.permute.xlu0 %v438_v13  ;;  %vm331_vm3 = vcmask 9216  }
   0x3   :  { %384 = vmatpush3.bf16.msra.mxu1 %v425_v0  ;;  %v433_v5 = vld [vmem:[%s559_s0] sm:$0xff]   ;;  %v434_v7 = vld [vmem:[%s559_s0 + $0x8] sm:$0xff]   ;;  %v431_v9 = vld [vmem:[%s558_s1 + $0x30] sm:$0xff]   ;;  %15 = vst [vmem:[#allocation3] sm:$0x1] %v14_v14  ;;  %v50_v41 = vshrl.u32 %v49_v40, 7 }
   0x4   :  { %385 = vmatprep.subr.bf16.mxu1 %v426_v2  ;;  %399 = vmatprep.mubr.bf16.mxu1 %v433_v5  ;;  %v429_v6 = vld [vmem:[%s558_s1 + $0x20] sm:$0xff]   ;;  %v430_v8 = vld [vmem:[%s558_s1 + $0x28] sm:$0xff]   ;;  %v432_v10 = vld [vmem:[%s558_s1 + $0x38] sm:$0xff]  }
   0x5   :  { %376 = vmatpush3.bf16.msra.mxu0 %v433_v5  ;;  %v42_v11 = vld [vmem:[%s560_s2] sm:$0x1]  ;;  %v51_v42 = vsub.s32 0, %v50_v41 }
   0x6   :  { %377 = vmatprep.subr.bf16.mxu0 %v435_v1  ;;  %v252_v16 = vld [vmem:[%s562_s5] sm:$0x3] }
   0x7   :  { %386 = vmatpush3.bf16.msra.mxu1 %v426_v2  ;;  %v251_v39 = vld [vmem:[%s564_s4] sm:$0x3] }
   0x8   :  { %387 = vmatprep.subr.bf16.mxu1 %v427_v3  ;;  %v112_v17 = vld [vmem:[#allocation2 + $0x10] sm:$0xff]  ;;  %v110_v18 = vld [vmem:[#allocation2] sm:$0xff] }
   0x9   :  { %378 = vmatpush3.bf16.msra.mxu0 %v434_v7  ;;  %v113_v20 = vld [vmem:[#allocation2 + $0x18] sm:$0xff]  ;;  %v111_v23 = vld [vmem:[#allocation2 + $0x8] sm:$0xff] }
   0xa   :  { %414 = vmatprep.subr.bf16.mxu0 %v437_v12  ;;  %v43_v15 = vld [vmem:[#allocation3] sm:$0x1] }
   0xb   :  { %388 = vmatpush3.bf16.msra.mxu1 %v427_v3  ;;  %46 = vperm.xlu0 %424, %v43_v15  }
   0xc   :  { %389 = vmatprep.subr.bf16.mxu1 %v428_v4  ;;  %380 = vmatmul.mubr.msk.bf16.vlgmr.msra.gmra.mrb[0].mxu0 %vm65_vm1, %v42_v11 }
   0xd   :  { %411 = vmatprep.mubr.msk.f32.mxu0 %vm436_vm2, %v435_v1 }
   0xf   :  { %390 = vmatpush3.bf16.msra.mxu1 %v428_v4  ;;  %255 = vperm.xlu0 %424, %v252_v16  }
  0x10   :  { %391 = vmatprep.subr.bf16.mxu1 %v429_v6 }
  0x13   :  { %392 = vmatpush3.bf16.msra.mxu1 %v429_v6 }
  0x14   :  { %393 = vmatprep.subr.bf16.mxu1 %v430_v8 }
  0x17   :  { %394 = vmatpush3.bf16.msra.mxu1 %v430_v8 }
  0x18   :  { %395 = vmatprep.subr.bf16.mxu1 %v431_v9 }
  0x1b   :  { %396 = vmatpush3.bf16.msra.mxu1 %v431_v9 }
  0x1c   :  { %397 = vmatprep.subr.bf16.mxu1 %v432_v10 }
  0x1f   :  { %398 = vmatpush3.bf16.msra.mxu1 %v432_v10 }
  0x22   :  { %400 = vmatmul.mubr.bf16.vlgmr.msra.gmra.mrb[0].mxu1 %v434_v7 }
  0x8a   :  { %v47_v43 = vpop.permute.xlu0 %46 }
  0x8b   :  { %v52_v44 = vrot.slane %v47_v43, %v51_v42 }
  0x8e   :  { %v256_v50 = vpop.permute.xlu0 %255 }
  0xdf   :  { %v103_v45 = vpop.f32.mrb[0].mxu0 }
  0xe0   :  { %v104_v46 = vadd.f32 %v103_v45, %v52_v44  ;;  %v381_v47 = vpop.f32.mrb[1].mxu0 }
  0xe1   :  { %v106_v48 = vpop.f32.mrb[2].mxu0 }
  0xe2   :  { %109 = vst [vmem:[%s565_s7] sm:$0x1] %v104_v46  ;;  %v382_v49 = vpop.f32.mrb[3].mxu0 }
  0xf5   :  { %v401_v19 = vpop.f32.mrb[0].mxu1 }
  0xf6   :  { %v229_v21 = vadd.f32 %v401_v19, %v112_v17  ;;  %v212_v22 = vpop.f32.mrb[1].mxu1 }
  0xf7   :  { %v227_v24 = vadd.f32 %v212_v22, %v110_v18  ;;  %v402_v25 = vpop.f32.mrb[2].mxu1 }
  0xf8   :  { %234 = vst.msk [vmem:[#allocation2 + $0x10] sm:$0xff] %vm33_vm0, %v229_v21  ;;  %v230_v26 = vadd.f32 %v402_v25, %v113_v20  ;;  %v215_v27 = vpop.f32.mrb[3].mxu1 }
  0xf9   :  { %232 = vst.msk [vmem:[#allocation2] sm:$0xff] %vm33_vm0, %v227_v24  ;;  %v228_v28 = vadd.f32 %v215_v27, %v111_v23 }
  0xfa   :  { %235 = vst.msk [vmem:[#allocation2 + $0x18] sm:$0xff] %vm33_vm0, %v230_v26 }
  0xfb   :  { %233 = vst.msk [vmem:[#allocation2 + $0x8] sm:$0xff] %vm33_vm0, %v228_v28 }
  0xff   :  { %v241_v29 = vld [vmem:[#allocation2 + $0x10] sm:$0xff] }
 0x100   :  { %v239_v30 = vld [vmem:[#allocation2] sm:$0xff]  ;;  %v245_v31 = vmul.f32 0.25, %v241_v29 }
 0x101   :  { %v243_v32 = vmul.f32 0.25, %v239_v30  ;;  %v242_v33 = vld [vmem:[#allocation2 + $0x18] sm:$0xff] }
 0x102   :  { %v240_v34 = vld [vmem:[#allocation2 + $0x8] sm:$0xff]  ;;  %v246_v35 = vmul.f32 0.25, %v242_v33  ;;  %249 = vst.msk [vmem:[%s563_s8 + $0x10] sm:$0xff] %vm33_vm0, %v245_v31 }
 0x103   :  { %v244_v36 = vmul.f32 0.25, %v240_v34  ;;  %247 = vst.msk [vmem:[%s563_s8] sm:$0xff] %vm33_vm0, %v243_v32 }
 0x104   :  { %250 = vst.msk [vmem:[%s563_s8 + $0x18] sm:$0xff] %vm33_vm0, %v246_v35  ;;  %v418_v38 = vpack.c.bf16 %v246_v35, %v245_v31 }
 0x105   :  { %248 = vst.msk [vmem:[%s563_s8 + $0x8] sm:$0xff] %vm33_vm0, %v244_v36  ;;  %v415_v37 = vpack.c.bf16 %v244_v36, %v243_v32 }
 0x107   :  { %416 = vmatpush3.bf16.msra.mxu0 %v415_v37 }
 0x108   :  { %417 = vmatprep.subr.bf16.mxu0 %v437_v12 }
 0x10b   :  { %419 = vmatpush3.bf16.msra.mxu0 %v418_v38 }
 0x10e   :  { %412 = vmatmul.mubr.msk.f32.vlgmr.msra.gmra.mrb[4].mxu0 %vm65_vm1, %v251_v39 }
 0x1e1   :  { %v327_v51 = vpop.f32.mrb[4].mxu0 }
 0x1e2   :  { %v328_v52 = vadd.f32 %v327_v51, %v256_v50  ;;  %v413_v53 = vpop.f32.mrb[5].mxu0 }
 0x1e4   :  { %332 = vst.msk [vmem:[%s566_s6] sm:$0x3] %vm331_vm3, %v328_v52 }

// kernel: discriminator_forward.10
= control target key start
LH: loop header
LB: loop body
LE: loop exit
PB: predicated region body
PF: predicated region fallthrough
CT: control target
= control target key end

     0   :  { %s497_s12 = smov 0   ;;  %s499_s13 = smov 0   ;;  %s555_s0 = inlined_call_operand.vmem [shape: bf16[8,48], index: 0, kind: input, shape index: {}]   ;;  %s556_s1 = inlined_call_operand.vmem [shape: bf16[48,512], index: 1, kind: input, shape index: {}]   ;;  %s557_s2 = inlined_call_operand.vmem [shape: f32[8,1], index: 2, kind: input, shape index: {}]   ;;  %s558_s3 = inlined_call_operand.vmem [shape: bf16[8,512], index: 3, kind: output, shape index: {}]  }
   0x1   :  { %s501_s14 = smov 0  }
   0x2 LB: > { %s394_s15 = sadd.s32 4294967295, %s474_s14   ;;  %s514_s16 = sadd.s32 1, %s474_s14   ;;  %s474_s14 = sphi %s501_s14, %s561_s14   ;;  %s470_s13 = sphi %s499_s13, %s560_s13   ;;  %s466_s12 = sphi %s497_s12, %s559_s12  }
   0x3   : > { %s38_s17 = ssub.s32 %s474_s14, %s514_s16  ;;  %s41_s18 = sadd.s32 1, %s470_s13 }
   0x4   : > { %p39_p0 = scmp.eq.s32.totalorder %s38_s17, 0  ;;  %p48_p1 = scmp.ne.s32.totalorder %s470_s13, %s466_s12 }
   0x5   : > { %p49_p2 = scmp.eq.s32.totalorder %s474_s14, 0  ;;  %p397_p4 = scmp.ge.s32.totalorder %s474_s14, 2 }
   0x6   : > { %s523_s19 = scalar_select %p39_p0, %s470_s13, %s41_s18  }
   0x7   : > { %p50_p3 = por %p49_p2, %p48_p1  ;;  %127 = sbr.rel (%p397_p4) target bundleno = 21 (0x15), region = 24 }
   0xe   : > { %130 = sbr.rel (!%p50_p3) target bundleno = 21 (0x15), region = 28  ;;  %s132_s20 = sand.u32 (%p50_p3), 1, %s470_s13  }
   0xf   : > { %s413_s21 = sshll.u32 (%p50_p3), %s474_s14, 3  ;;  %s415_s22 = smul.u32 (%p50_p3), 48, %s132_s20 }
  0x10   : > { %s137_s25 = scalar_lea.vmem (%p50_p3), %s556_s1, %s413_s21 }
  0x11   : > { %v175_v0 = vld [vmem:[%s137_s25] sm:$0xff] (%p50_p3)  ;;  %v177_v1 = vld [vmem:[%s137_s25 + $0x10] sm:$0xff] (%p50_p3)  ;;  %s134_s26 = scalar_lea.vmem (%p50_p3), [#allocation2], %s415_s22 }
  0x12   : > { %v179_v2 = vld [vmem:[%s137_s25 + $0x20] sm:$0xff] (%p50_p3)  ;;  %v181_v3 = vld [vmem:[%s137_s25 + $0x30] sm:$0xff] (%p50_p3)  ;;  %176 = vst [vmem:[%s134_s26] sm:$0xff] (%p50_p3), %v175_v0  ;;  %178 = vst [vmem:[%s134_s26 + $0x8] sm:$0xff] (%p50_p3), %v177_v1 }
  0x13   : > { %v183_v4 = vld [vmem:[%s137_s25 + $0x40] sm:$0xff] (%p50_p3)  ;;  %v185_v5 = vld [vmem:[%s137_s25 + $0x50] sm:$0xff] (%p50_p3)  ;;  %180 = vst [vmem:[%s134_s26 + $0x10] sm:$0xff] (%p50_p3), %v179_v2  ;;  %182 = vst [vmem:[%s134_s26 + $0x18] sm:$0xff] (%p50_p3), %v181_v3 }
  0x14   : > { %184 = vst [vmem:[%s134_s26 + $0x20] sm:$0xff] (%p50_p3), %v183_v4  ;;  %186 = vst [vmem:[%s134_s26 + $0x28] sm:$0xff] (%p50_p3), %v185_v5 }
  0x15 PF: > { %p400_p5 = scmp.ge.s32.totalorder %s474_s14, 1  ;;  %p191_p6 = scmp.lt.s32.totalorder %s474_s14, 3 }
  0x17   : > { %p192_p7 = pnand %p400_p5, %p191_p6 }
  0x18   : > { %s198_s27 = sand.u32 (!%p192_p7), 1, %s466_s12   ;;  %v236_v6 = vld [vmem:[%s557_s2] sm:$0xff] (!%p192_p7)  ;;  %v476_v7 = vmov (!%p192_p7), 0   ;;  %vm272_vm0 = vcmask (!%p192_p7), 392192   ;;  %s401_s7 = sshll.u32 (!%p192_p7), %s394_s15, 1 }
  0x19   : > { %195 = sbr.rel (%p192_p7) target bundleno = 263 (0x107), region = 66  ;;  %308 = vmatprep.mubr.bf16.mxu0 (!%p192_p7), %v476_v7  ;;  %442 = vset.pattern.permute.xlu0 (!%p192_p7), %v476_v7  ;;  %v229_v14 = vld [vmem:[%s555_s0] sm:$0xf] (!%p192_p7)  ;;  %p223_p8 = scmp.lt.s32.totalorder (!%p192_p7), %s401_s7, 3 }
  0x1a   : > { %s416_s30 = smul.u32 (!%p192_p7), 48, %s198_s27  ;;  %239 = vperm.xlu0 (!%p192_p7), %442, %v236_v6  }
  0x1c   : > { %s200_s4 = scalar_lea.vmem (!%p192_p7), [#allocation2], %s416_s30 }
  0x1d   : > { %v443_v8 = vld [vmem:[%s200_s4 + $0x4] ss:$8 sps:$4 sm:$0xff] (!%p192_p7)   ;;  %v445_v9 = vld [vmem:[%s200_s4] ss:$8 sps:$4 sm:$0xff] (!%p192_p7)   ;;  %v446_v10 = vld [vmem:[%s200_s4 + $0x14] ss:$8 sps:$4 sm:$0xff] (!%p192_p7)  }
  0x1e   : > { %276 = vmatprep.subr.bf16.mxu0 (!%p192_p7), %v443_v8  ;;  %v448_v11 = vld [vmem:[%s200_s4 + $0x10] ss:$8 sps:$4 sm:$0xff] (!%p192_p7)   ;;  %v449_v12 = vld [vmem:[%s200_s4 + $0x24] ss:$8 sps:$4 sm:$0xff] (!%p192_p7)   ;;  %v451_v13 = vld [vmem:[%s200_s4 + $0x20] ss:$8 sps:$4 sm:$0xff] (!%p192_p7)  }
  0x1f   : > { %277 = vmatpush1.bf16.msra.mxu0 (!%p192_p7), %v445_v9 }
  0x20   : > { %278 = vmatprep.subr.bf16.mxu0 %v446_v10  ;;  %s563_s7 = smov (!%p223_p8, %s401_s7), 3 }
  0x21   : > { %s402_s8 = sshll.u32 %s563_s7, 2 }
  0x22   : > { %s226_s11 = scalar_lea.vmem %s558_s3, %s402_s8 }
  0x23   : > { %279 = vmatpush1.bf16.msra.mxu0 %v448_v11 }
  0x24   : > { %280 = vmatprep.subr.bf16.mxu0 %v449_v12 }
  0x27   : > { %281 = vmatpush1.bf16.msra.mxu0 %v451_v13 }
  0x2a   : > { %409 = vmatmul.mubr.msk.bf16.vlgmr.msra.gmra.mrb[0].mxu0 %vm272_vm0, %v229_v14 }
  0x99   : > { %v240_v15 = vpop.permute.xlu0 %239 }
  0xfd   : > { %v310_v16 = vpop.f32.mrb[0].mxu0 }
  0xfe   : > { %v311_v17 = vadd.f32 %v310_v16, %v240_v15  ;;  %v312_v18 = vpop.f32.mrb[1].mxu0 }
  0xff   : > { %v313_v19 = vadd.f32 %v312_v18, %v240_v15  ;;  %v314_v20 = vpop.f32.mrb[2].mxu0 }
 0x100   : > { %vm317_vm1 = vcmp.ge.f32.partialorder %v311_v17, 0.0  ;;  %v319_v21 = vmul.f32 0.2, %v311_v17  ;;  %v315_v22 = vpop.f32.mrb[3].mxu0 }
 0x101   : > { %vm318_vm2 = vcmp.ge.f32.partialorder %v313_v19, 0.0  ;;  %v320_v23 = vmul.f32 0.2, %v313_v19 }
 0x102   : > { %v321_v24 = vsel %vm317_vm1, %v311_v17, %v319_v21 }
 0x103   : > { %v322_v25 = vsel %vm318_vm2, %v313_v19, %v320_v23 }
 0x104   : > { %v414_v26 = vpack.c.bf16 %v322_v25, %v321_v24 }
 0x106   : > { %331 = vst [vmem:[%s226_s11] sm:$0xff] %v414_v26 }
 0x107 PF: > { %p10_p9 = scmp.ge.s32.totalorder %s514_s16, 4   ;;  %s559_s12 = smov %s470_s13 }
 0x108   : > { %s560_s13 = smov %s523_s19  ;;  %s561_s14 = smov %s514_s16 }
 0x109   :  { %12 = sbr.rel (!%p10_p9) target bundleno = 2 (0x2), region = 105 }

// kernel: discriminator_forward.11
= control target key start
LH: loop header
LB: loop body
LE: loop exit
PB: predicated region body
PF: predicated region fallthrough
CT: control target
= control target key end

     0   :  { %v220_v0 = vmov 0.0   ;;  %vm221_vm0 = vmmov 0   ;;  %v222_v2 = vmov 0   ;;  %s279_s1 = inlined_call_operand.vmem [shape: bf16[128,128], index: 1, kind: input, shape index: {}]   ;;  %s280_s2 = inlined_call_operand.vmem [shape: f32[16,1], index: 2, kind: input, shape index: {}]   ;;  %s281_s0 = inlined_call_operand.vmem [shape: bf16[16,128], index: 0, kind: input, shape index: {}]   ;;  %s282_s3 = inlined_call_operand.vmem [shape: bf16[16,128], index: 3, kind: output, shape index: {}]  }
   0x1   :  { %187 = vmatprep.subr.bf16.mxu0 %v220_v0  ;;  %v211_v1 = vld [vmem:[%s279_s1] sm:$0xff]   ;;  %203 = vmatprep.mubr.msk.bf16.mxu0 %vm221_vm0, %v220_v0  ;;  %v212_v3 = vld [vmem:[%s279_s1 + $0x8] sm:$0xff]   ;;  %v213_v4 = vld [vmem:[%s279_s1 + $0x10] sm:$0xff]  }
   0x2   :  { %210 = vset.pattern.permute.xlu0 %v222_v2  ;;  %188 = vmatpush3.bf16.msra.mxu0 %v211_v1  ;;  %v33_v5 = vld [vmem:[%s280_s2] sm:$0xff]  ;;  %v214_v6 = vld [vmem:[%s279_s1 + $0x18] sm:$0xff]   ;;  %v34_v7 = vld [vmem:[%s280_s2 + $0x8] sm:$0xff] }
   0x3   :  { %189 = vmatprep.subr.bf16.mxu0 %v220_v0  ;;  %37 = vperm.xlu0 %210, %v33_v5   ;;  %v215_v8 = vld [vmem:[%s279_s1 + $0x20] sm:$0xff]   ;;  %v216_v9 = vld [vmem:[%s279_s1 + $0x28] sm:$0xff]   ;;  %v217_v10 = vld [vmem:[%s279_s1 + $0x30] sm:$0xff]  }
   0x4   :  { %v218_v11 = vld [vmem:[%s279_s1 + $0x38] sm:$0xff]   ;;  %v219_v12 = vld [vmem:[%s281_s0] sm:$0xff]  }
   0x6   :  { %190 = vmatpush3.bf16.msra.mxu0 %v212_v3 }
   0x7   :  { %191 = vmatprep.subr.bf16.mxu0 %v220_v0  ;;  %42 = vperm.xlu0 %210, %v34_v7  }
   0xa   :  { %192 = vmatpush3.bf16.msra.mxu0 %v213_v4 }
   0xb   :  { %193 = vmatprep.subr.bf16.mxu0 %v220_v0 }
   0xe   :  { %194 = vmatpush3.bf16.msra.mxu0 %v214_v6 }
   0xf   :  { %195 = vmatprep.subr.bf16.mxu0 %v220_v0 }
  0x12   :  { %196 = vmatpush3.bf16.msra.mxu0 %v215_v8 }
  0x13   :  { %197 = vmatprep.subr.bf16.mxu0 %v220_v0 }
  0x16   :  { %198 = vmatpush3.bf16.msra.mxu0 %v216_v9 }
  0x17   :  { %199 = vmatprep.subr.bf16.mxu0 %v220_v0 }
  0x1a   :  { %200 = vmatpush3.bf16.msra.mxu0 %v217_v10 }
  0x1b   :  { %201 = vmatprep.subr.bf16.mxu0 %v220_v0 }
  0x1e   :  { %202 = vmatpush3.bf16.msra.mxu0 %v218_v11 }
  0x21   :  { %204 = vmatmul.mubr.bf16.vlgmr.msra.gmra.mrb[0].mxu0 %v219_v12 }
  0x82   :  { %v38_v13 = vpop.permute.xlu0 %37 }
  0x86   :  { %v43_v17 = vpop.permute.xlu0 %42 }
  0xf4   :  { %v133_v14 = vpop.f32.mrb[0].mxu0 }
  0xf5   :  { %v134_v15 = vadd.f32 %v133_v14, %v38_v13  ;;  %v205_v16 = vpop.f32.mrb[1].mxu0 }
  0xf6   :  { %v136_v18 = vpop.f32.mrb[2].mxu0 }
  0xf7   :  { %v142_v19 = vmul.f32 0.2, %v134_v15  ;;  %v137_v20 = vadd.f32 %v136_v18, %v43_v17  ;;  %v206_v21 = vpop.f32.mrb[3].mxu0  ;;  %vm140_vm1 = vcmp.ge.f32.partialorder %v134_v15, 0.0 }
  0xf9   :  { %vm141_vm2 = vcmp.ge.f32.partialorder %v137_v20, 0.0  ;;  %v143_v22 = vmul.f32 0.2, %v137_v20  ;;  %v144_v23 = vsel %vm140_vm1, %v134_v15, %v142_v19 }
  0xfb   :  { %v145_v24 = vsel %vm141_vm2, %v137_v20, %v143_v22 }
  0xfc   :  { %v176_v25 = vpack.c.bf16 %v145_v24, %v144_v23 }
  0xfe   :  { %177 = vst [vmem:[%s282_s3] sm:$0xff] %v176_v25  }

// kernel: discriminator_forward.13
= control target key start
LH: loop header
LB: loop body
LE: loop exit
PB: predicated region body
PF: predicated region fallthrough
CT: control target
= control target key end

     0   :  { %s601_s0 = inlined_call_operand.vmem [shape: bf16[32,128], index: 0, kind: input, shape index: {}]   ;;  %s602_s1 = inlined_call_operand.vmem [shape: bf16[128,2], index: 1, kind: input, shape index: {}]   ;;  %s603_s2 = inlined_call_operand.vmem [shape: bf16[1,32], index: 2, kind: input, shape index: {}]   ;;  %s604_s3 = inlined_call_operand.<no memory space> [shape: f32[1,1], index: 3, kind: input, shape index: {}]   ;;  %s605_s4 = inlined_call_operand.vmem [shape: f32[2,32], index: 4, kind: input, shape index: {}]   ;;  %s606_s5 = inlined_call_operand.vmem [shape: f32[2,1], index: 5, kind: input, shape index: {}]   ;;  %s607_s6 = inlined_call_operand.vmem [shape: f32[2,2], index: 6, kind: output, shape index: {0}]   ;;  %s608_s7 = inlined_call_operand.vmem [shape: f32[1,128], index: 7, kind: output, shape index: {1}]   ;;  %s609_s8 = inlined_call_operand.hbm [shape: f32[32,2], index: 8, kind: output, shape index: {2}]  }
   0x1   :  { %v14_v0 = vstv %s604_s3 }
   0x2   :  { %15 = vst [vmem:[#allocation3] sm:$0x1] %v14_v0 }
   0x3   :  { %v441_v1 = vld [vmem:[%s602_s1] sm:$0xff]   ;;  %vm34_vm0 = vcmask 15360   ;;  %v442_v2 = vld [vmem:[%s602_s1 + $0x8] sm:$0xff]   ;;  %v475_v3 = vmov 0.0   ;;  %v443_v4 = vld [vmem:[%s602_s1 + $0x10] sm:$0xff]  }
   0x4   :  { %396 = vmatprep.subr.bf16.mxu1 %v441_v1  ;;  %37 = vst.msk [vmem:[#allocation2 + $0x10] sm:$0xff] %vm34_vm0, %v475_v3  ;;  %35 = vst.msk [vmem:[#allocation2] sm:$0xff] %vm34_vm0, %v475_v3  ;;  %388 = vmatprep.subr.bf16.mxu0 %v475_v3  ;;  %v444_v5 = vld [vmem:[%s602_s1 + $0x18] sm:$0xff]   ;;  %v449_v6 = vld [vmem:[%s601_s0] sm:$0xff]  }
   0x5   :  { %36 = vst.msk [vmem:[#allocation2 + $0x8] sm:$0xff] %vm34_vm0, %v475_v3  ;;  %38 = vst.msk [vmem:[#allocation2 + $0x18] sm:$0xff] %vm34_vm0, %v475_v3  ;;  %397 = vmatpush3.bf16.msra.mxu1 %v441_v1  ;;  %412 = vmatprep.mubr.bf16.mxu1 %v449_v6 }
   0x6   :  { %398 = vmatprep.subr.bf16.mxu1 %v442_v2  ;;  %389 = vmatpush3.bf16.msra.mxu0 %v449_v6 }
   0x9   :  { %399 = vmatpush3.bf16.msra.mxu1 %v442_v2 }
   0xa   :  { %400 = vmatprep.subr.bf16.mxu1 %v443_v4 }
   0xb   :  { %16 = vsyncpa [#allocation5], 0  ;;  %390 = vmatprep.subr.bf16.mxu0 %v475_v3  ;;  %v445_v7 = vld [vmem:[%s602_s1 + $0x20] sm:$0xff]   ;;  %v450_v8 = vld [vmem:[%s601_s0 + $0x8] sm:$0xff]   ;;  %vm66_vm1 = vcmask 261120   ;;  %vm476_vm2 = vmmov 0   ;;  %v50_v40 = vlaneseq }
   0xc   :  { %391 = vmatpush3.bf16.msra.mxu0 %v450_v8  ;;  %v446_v9 = vld [vmem:[%s602_s1 + $0x28] sm:$0xff]   ;;  %v447_v10 = vld [vmem:[%s602_s1 + $0x30] sm:$0xff]   ;;  %v448_v11 = vld [vmem:[%s602_s1 + $0x38] sm:$0xff]   ;;  %392 = vmatprep.mubr.msk.bf16.mxu0 %vm476_vm2, %v475_v3  ;;  %v477_v13 = vmov 0.0|0.0   ;;  %v478_v15 = vmov 0   ;;  %s479_s30 = smov [#allocation4]  }
   0xd   :  { %401 = vmatpush3.bf16.msra.mxu1 %v443_v4  ;;  %v43_v12 = vld [vmem:[%s603_s2] sm:$0x1]  ;;  %427 = vmatprep.subr.bf16.mxu0 %v477_v13  ;;  %v113_v17 = vld [vmem:[#allocation2 + $0x10] sm:$0xff]  ;;  %v114_v20 = vld [vmem:[#allocation2 + $0x18] sm:$0xff]  ;;  %v51_v41 = vshrl.u32 %v50_v40, 7  ;;  %s343_s9 = sshll.u32 %s479_s30, 4  ;;  %s344_s9 = int_to_ptr.vmem [resolvable:$true] %s343_s9 }
   0xe   :  { %402 = vmatprep.subr.bf16.mxu1 %v444_v5  ;;  %v44_v14 = vld [vmem:[#allocation3] sm:$0x1]  ;;  %440 = vset.pattern.permute.xlu0 %v478_v15  ;;  %v112_v23 = vld [vmem:[#allocation2 + $0x8] sm:$0xff]  ;;  %p456_p1 = scmp.lt.s32.totalorder %s344_s9, %s344_s9 }
   0xf   :  { %393 = vmatmul.mubr.msk.bf16.vlgmr.msra.gmra.mrb[0].mxu0 %vm66_vm1, %v43_v12  ;;  %47 = vperm.xlu0 %440, %v44_v14   ;;  %v253_v16 = vld [vmem:[%s606_s5] sm:$0x3]  ;;  %v52_v42 = vsub.s32 0, %v51_v41 }
  0x10   :  { %424 = vmatprep.mubr.msk.f32.mxu0 %vm476_vm2, %v475_v3  ;;  %v111_v18 = vld [vmem:[#allocation2] sm:$0xff] }
  0x11   :  { %403 = vmatpush3.bf16.msra.mxu1 %v444_v5  ;;  %v252_v39 = vld [vmem:[%s605_s4] sm:$0x3]  ;;  %s451_s4 = scalar_lea.vmem %s344_s9, 512 }
  0x12   :  { %404 = vmatprep.subr.bf16.mxu1 %v445_v7  ;;  %p452_p0 = scmp.ne.s32.totalorder %s344_s9, %s451_s4  ;;  %p457_p2 = scmp.lt.s32.totalorder %s451_s4, %s451_s4 }
  0x13   :  { %256 = vperm.xlu0 %440, %v253_v16  }
  0x14   :  { %p458_p3 = por %p457_p2, %p456_p1 }
  0x15   :  { %405 = vmatpush3.bf16.msra.mxu1 %v445_v7 }
  0x16   :  { %406 = vmatprep.subr.bf16.mxu1 %v446_v9  ;;  %p459_p4 = pnand %p458_p3, %p452_p0 }
  0x19   :  { %407 = vmatpush3.bf16.msra.mxu1 %v446_v9 }
  0x1a   :  { %408 = vmatprep.subr.bf16.mxu1 %v447_v10 }
  0x1d   :  { %409 = vmatpush3.bf16.msra.mxu1 %v447_v10 }
  0x1e   :  { %410 = vmatprep.subr.bf16.mxu1 %v448_v11 }
  0x21   :  { %411 = vmatpush3.bf16.msra.mxu1 %v448_v11 }
  0x24   :  { %413 = vmatmul.mubr.bf16.vlgmr.msra.gmra.mrb[0].mxu1 %v450_v8 }
  0x8e   :  { %v48_v43 = vpop.permute.xlu0 %47 }
  0x8f   :  { %v53_v44 = vrot.slane %v48_v43, %v52_v42 }
  0xe2   :  { %v104_v45 = vpop.f32.mrb[0].mxu0 }
  0xe3   :  { %v105_v46 = vadd.f32 %v104_v45, %v53_v44  ;;  %v394_v47 = vpop.f32.mrb[1].mxu0 }
  0xe4   :  { %v107_v48 = vpop.f32.mrb[2].mxu0 }
  0xe5   :  { %110 = vst [vmem:[%s608_s7] sm:$0x1] %v105_v46  ;;  %v395_v49 = vpop.f32.mrb[3].mxu0 }
  0xf7   :  { %v414_v19 = vpop.f32.mrb[0].mxu1 }
  0xf8   :  { %v230_v21 = vadd.f32 %v414_v19, %v113_v17  ;;  %v213_v22 = vpop.f32.mrb[1].mxu1 }
  0xf9   :  { %v228_v24 = vadd.f32 %v213_v22, %v111_v18  ;;  %v415_v25 = vpop.f32.mrb[2].mxu1 }
  0xfa   :  { %235 = vst.msk [vmem:[#allocation2 + $0x10] sm:$0xff] %vm34_vm0, %v230_v21  ;;  %v231_v26 = vadd.f32 %v415_v25, %v114_v20  ;;  %v216_v27 = vpop.f32.mrb[3].mxu1 }
  0xfb   :  { %233 = vst.msk [vmem:[#allocation2] sm:$0xff] %vm34_vm0, %v228_v24  ;;  %v229_v28 = vadd.f32 %v216_v27, %v112_v23 }
  0xfc   :  { %236 = vst.msk [vmem:[#allocation2 + $0x18] sm:$0xff] %vm34_vm0, %v231_v26 }
  0xfd   :  { %234 = vst.msk [vmem:[#allocation2 + $0x8] sm:$0xff] %vm34_vm0, %v229_v28 }
 0x101   :  { %v242_v29 = vld [vmem:[#allocation2 + $0x10] sm:$0xff] }
 0x102   :  { %v240_v30 = vld [vmem:[#allocation2] sm:$0xff]  ;;  %v246_v31 = vmul.f32 0.0625, %v242_v29 }
 0x103   :  { %v244_v32 = vmul.f32 0.0625, %v240_v30  ;;  %v243_v33 = vld [vmem:[#allocation2 + $0x18] sm:$0xff] }
 0x104   :  { %v241_v34 = vld [vmem:[#allocation2 + $0x8] sm:$0xff]  ;;  %v247_v35 = vmul.f32 0.0625, %v243_v33  ;;  %250 = vst.msk [vmem:[#allocation4 + $0x10] sm:$0xff] %vm34_vm0, %v246_v31 }
 0x105   :  { %v245_v36 = vmul.f32 0.0625, %v241_v34  ;;  %248 = vst.msk [vmem:[#allocation4] sm:$0xff] %vm34_vm0, %v244_v32 }
 0x106   :  { %251 = vst.msk [vmem:[#allocation4 + $0x18] sm:$0xff] %vm34_vm0, %v247_v35  ;;  %v431_v38 = vpack.c.bf16 %v247_v35, %v246_v31 }
 0x107   :  { %249 = vst.msk [vmem:[#allocation4 + $0x8] sm:$0xff] %vm34_vm0, %v245_v36  ;;  %v428_v37 = vpack.c.bf16 %v245_v36, %v244_v32 }
 0x109   :  { %429 = vmatpush3.bf16.msra.mxu0 %v428_v37 }
 0x10a   :  { %430 = vmatprep.subr.bf16.mxu0 %v477_v13 }
 0x10d   :  { %432 = vmatpush3.bf16.msra.mxu0 %v431_v38 }
 0x110   :  { %425 = vmatmul.mubr.msk.f32.vlgmr.msra.gmra.mrb[4].mxu0 %vm66_vm1, %v252_v39 }
 0x111   :  { %462 = shalt.err (!%p459_p4)
}
 0x112   :  { %s463_s11 = scalar_lea.hbm %s609_s8, 512 }
 0x113   :  { %p464_p5 = scmp.ne.s32.totalorder %s609_s8, %s463_s11  ;;  %p467_p6 = scmp.lt.u32.totalorder %s463_s11, %s609_s8 }
 0x115   :  { %p469_p7 = pnand %p467_p6, %p464_p5 }
 0x117   :  { %472 = shalt.err (!%p469_p7)
}
 0x118   :  { %s480_s15 = smov 128   ;;  %s481_s16 = smov 8   ;;  %v257_v50 = vpop.permute.xlu0 %256  ;;  %vm332_vm3 = vcmask 9216  }
 0x119   :  { %349 = dma.vmem_to_hbm [thread:$0]  %s344_s9, 512, %s609_s8, [#allocation5], %s480_s15, %s480_s15, %s481_s16  }
 0x1e3   :  { %v328_v51 = vpop.f32.mrb[4].mxu0 }
 0x1e4   :  { %v329_v52 = vadd.f32 %v328_v51, %v257_v50  ;;  %v426_v53 = vpop.f32.mrb[5].mxu0 }
 0x1e6   :  { %333 = vst.msk [vmem:[%s607_s6] sm:$0x3] %vm332_vm3, %v329_v52 }
 0x1e7   :  { %473 = dma.done.wait [#allocation5], 512  }
 0x1e8   :  { %474 = vsyncadd [#allocation5], 4294966784 }
 0x1e9   :  { %357 = vsyncpa [#allocation5], 1 }

// kernel: discriminator_forward.12
= control target key start
LH: loop header
LB: loop body
LE: loop exit
PB: predicated region body
PF: predicated region fallthrough
CT: control target
= control target key end

     0   :  { %v384_v1 = vmov 0   ;;  %s483_s1 = inlined_call_operand.vmem [shape: bf16[256,128], index: 1, kind: input, shape index: {}]   ;;  %s484_s0 = inlined_call_operand.vmem [shape: bf16[32,256], index: 0, kind: input, shape index: {}]   ;;  %s485_s2 = inlined_call_operand.vmem [shape: f32[32,1], index: 2, kind: input, shape index: {}]   ;;  %s486_s3 = inlined_call_operand.vmem [shape: bf16[32,128], index: 3, kind: output, shape index: {}]  }
   0x1   :  { %v362_v0 = vld [vmem:[%s483_s1 + $0x40] sm:$0xff]   ;;  %361 = vset.pattern.permute.xlu1 %v384_v1  ;;  %360 = vset.pattern.permute.xlu0 %v384_v1  ;;  %v364_v3 = vld [vmem:[%s483_s1 + $0x48] sm:$0xff]   ;;  %v366_v5 = vld [vmem:[%s483_s1 + $0x50] sm:$0xff]  }
   0x2   :  { %v363_v2 = vld [vmem:[%s483_s1] sm:$0xff]   ;;  %315 = vmatprep.subr.bf16.mxu0 %v362_v0  ;;  %343 = vmatprep.subr.bf16.mxu1 %v362_v0  ;;  %v365_v4 = vld [vmem:[%s483_s1 + $0x8] sm:$0xff]   ;;  %v367_v6 = vld [vmem:[%s483_s1 + $0x10] sm:$0xff]  }
   0x3   :  { %316 = vmatpush3.bf16.msra.mxu0 %v363_v2  ;;  %351 = vmatpush3.bf16.msra.mxu1 %v363_v2  ;;  %v368_v7 = vld [vmem:[%s483_s1 + $0x58] sm:$0xff]   ;;  %v370_v9 = vld [vmem:[%s483_s1 + $0x60] sm:$0xff]   ;;  %v372_v11 = vld [vmem:[%s483_s1 + $0x68] sm:$0xff]  }
   0x4   :  { %317 = vmatprep.subr.bf16.mxu0 %v364_v3  ;;  %344 = vmatprep.subr.bf16.mxu1 %v364_v3  ;;  %v369_v8 = vld [vmem:[%s483_s1 + $0x18] sm:$0xff]   ;;  %v371_v10 = vld [vmem:[%s483_s1 + $0x20] sm:$0xff]   ;;  %v373_v14 = vld [vmem:[%s483_s1 + $0x28] sm:$0xff]  }
   0x5   :  { %v380_v12 = vld [vmem:[%s484_s0 + $0x4] ss:$8 sps:$4 sm:$0xff]   ;;  %v383_v13 = vld [vmem:[%s484_s0 + $0x14] ss:$8 sps:$4 sm:$0xff]   ;;  %v378_v23 = vld [vmem:[%s484_s0] ss:$8 sps:$4 sm:$0xff]  }
   0x6   :  { %v53_v15 = vld [vmem:[%s485_s2 + $0x10] sm:$0xff]  ;;  %v51_v16 = vld [vmem:[%s485_s2] sm:$0xff]  ;;  %223 = vmatprep.mubr.bf16.mxu0 %v380_v12  ;;  %231 = vmatprep.mubr.bf16.mxu1 %v383_v13  ;;  %v54_v19 = vld [vmem:[%s485_s2 + $0x18] sm:$0xff] }
   0x7   :  { %318 = vmatpush3.bf16.msra.mxu0 %v365_v4  ;;  %352 = vmatpush3.bf16.msra.mxu1 %v365_v4  ;;  %v374_v17 = vld [vmem:[%s483_s1 + $0x70] sm:$0xff]   ;;  %v52_v20 = vld [vmem:[%s485_s2 + $0x8] sm:$0xff]  ;;  %v376_v21 = vld [vmem:[%s483_s1 + $0x78] sm:$0xff]  }
   0x8   :  { %319 = vmatprep.subr.bf16.mxu0 %v366_v5  ;;  %345 = vmatprep.subr.bf16.mxu1 %v366_v5  ;;  %v375_v18 = vld [vmem:[%s483_s1 + $0x30] sm:$0xff]   ;;  %v377_v22 = vld [vmem:[%s483_s1 + $0x38] sm:$0xff]  }
   0x9   :  { %67 = vperm.xlu1 %361, %v53_v15   ;;  %57 = vperm.xlu0 %360, %v51_v16   ;;  %v381_v24 = vld [vmem:[%s484_s0 + $0x10] ss:$8 sps:$4 sm:$0xff]  }
   0xb   :  { %320 = vmatpush3.bf16.msra.mxu0 %v367_v6  ;;  %353 = vmatpush3.bf16.msra.mxu1 %v367_v6 }
   0xc   :  { %321 = vmatprep.subr.bf16.mxu0 %v368_v7  ;;  %346 = vmatprep.subr.bf16.mxu1 %v368_v7 }
   0xd   :  { %72 = vperm.xlu1 %361, %v54_v19   ;;  %62 = vperm.xlu0 %360, %v52_v20  }
   0xf   :  { %322 = vmatpush3.bf16.msra.mxu0 %v369_v8  ;;  %354 = vmatpush3.bf16.msra.mxu1 %v369_v8 }
  0x10   :  { %323 = vmatprep.subr.bf16.mxu0 %v370_v9  ;;  %347 = vmatprep.subr.bf16.mxu1 %v370_v9 }
  0x13   :  { %324 = vmatpush3.bf16.msra.mxu0 %v371_v10  ;;  %355 = vmatpush3.bf16.msra.mxu1 %v371_v10 }
  0x14   :  { %325 = vmatprep.subr.bf16.mxu0 %v372_v11  ;;  %348 = vmatprep.subr.bf16.mxu1 %v372_v11 }
  0x17   :  { %326 = vmatpush3.bf16.msra.mxu0 %v373_v14  ;;  %356 = vmatpush3.bf16.msra.mxu1 %v373_v14 }
  0x18   :  { %327 = vmatprep.subr.bf16.mxu0 %v374_v17  ;;  %349 = vmatprep.subr.bf16.mxu1 %v374_v17 }
  0x1b   :  { %328 = vmatpush3.bf16.msra.mxu0 %v375_v18  ;;  %357 = vmatpush3.bf16.msra.mxu1 %v375_v18 }
  0x1c   :  { %329 = vmatprep.subr.bf16.mxu0 %v376_v21  ;;  %350 = vmatprep.subr.bf16.mxu1 %v376_v21 }
  0x1f   :  { %330 = vmatpush3.bf16.msra.mxu0 %v377_v22  ;;  %358 = vmatpush3.bf16.msra.mxu1 %v377_v22 }
  0x22   :  { %224 = vmatmul.mubr.bf16.vlgmr.msra.gmra.mrb[0].mxu0 %v378_v23  ;;  %232 = vmatmul.mubr.bf16.vlgmr.msra.gmra.mrb[0].mxu1 %v381_v24 }
  0x88   :  { %v68_v25 = vpop.permute.xlu1 %67  ;;  %v58_v26 = vpop.permute.xlu0 %57 }
  0x8c   :  { %v73_v41 = vpop.permute.xlu1 %72  ;;  %v63_v42 = vpop.permute.xlu0 %62 }
  0xf5   :  { %v331_v27 = vpop.f32.mrb[0].mxu0  ;;  %v337_v28 = vpop.f32.mrb[0].mxu1 }
  0xf6   :  { %v332_v29 = vpop.f32.mrb[1].mxu0  ;;  %v338_v30 = vpop.f32.mrb[1].mxu1 }
  0xf7   :  { %v333_v31 = vadd.f32 %v332_v29, %v331_v27  ;;  %v339_v32 = vadd.f32 %v338_v30, %v337_v28  ;;  %v334_v33 = vpop.f32.mrb[2].mxu0  ;;  %v340_v34 = vpop.f32.mrb[2].mxu1 }
  0xf8   :  { %v335_v35 = vpop.f32.mrb[3].mxu0  ;;  %v341_v36 = vpop.f32.mrb[3].mxu1 }
  0xf9   :  { %v226_v37 = vadd.f32 %v333_v31, %v58_v26  ;;  %v234_v38 = vadd.f32 %v339_v32, %v68_v25  ;;  %v336_v39 = vadd.f32 %v335_v35, %v334_v33  ;;  %v342_v40 = vadd.f32 %v341_v36, %v340_v34 }
  0xfb   :  { %v244_v43 = vmul.f32 0.2, %v226_v37  ;;  %v246_v44 = vmul.f32 0.2, %v234_v38  ;;  %v229_v45 = vadd.f32 %v336_v39, %v63_v42  ;;  %v237_v46 = vadd.f32 %v342_v40, %v73_v41 }
  0xfc   :  { %vm240_vm0 = vcmp.ge.f32.partialorder %v226_v37, 0.0  ;;  %vm242_vm1 = vcmp.ge.f32.partialorder %v234_v38, 0.0 }
  0xfd   :  { %vm241_vm2 = vcmp.ge.f32.partialorder %v229_v45, 0.0  ;;  %v245_v47 = vmul.f32 0.2, %v229_v45  ;;  %vm243_vm3 = vcmp.ge.f32.partialorder %v237_v46, 0.0  ;;  %v247_v48 = vmul.f32 0.2, %v237_v46 }
  0xfe   :  { %v248_v49 = vsel %vm240_vm0, %v226_v37, %v244_v43  ;;  %v250_v50 = vsel %vm242_vm1, %v234_v38, %v246_v44 }
  0xff   :  { %v249_v51 = vsel %vm241_vm2, %v229_v45, %v245_v47  ;;  %v251_v52 = vsel %vm243_vm3, %v237_v46, %v247_v48 }
 0x100   :  { %v307_v53 = vpack.c.bf16 %v249_v51, %v248_v49  ;;  %v312_v54 = vpack.c.bf16 %v251_v52, %v250_v50 }
 0x102   :  { %308 = vst [vmem:[%s486_s3] sm:$0xff] %v307_v53   ;;  %314 = vst [vmem:[%s486_s3 + $0x8] sm:$0xff] %v312_v54  }

</bundles_post_ra>
